<compile_context>
chip_gen: v7x
topology: tpu7x:2x2x1
jax: 0.10.0
libtpu: 0.0.40
codegen_flags: <defaults>
</compile_context>

<pallas_src>
import jax
import jax.numpy as jnp
from jax import lax
from jax.experimental import pallas as pl
from jax.experimental.pallas import tpu as pltpu

EPS = 1e-5


# --------------------------------- wrapper ---------------------------------- #
def affine_global_attention_forward(x, p):
    B, C, H, W = x.shape
    N = B * H * W
    BW, BH = B * W, B * H
    f32 = jnp.float32

    # lane-dense layout: (B, C, H, W) -> (C, B*H*W), column n = b*H*W + h*W + w
    x2 = jnp.transpose(jnp.asarray(x, f32), (1, 0, 2, 3)).reshape(C, N)

    n = jnp.arange(N)
    b_idx = n // (H * W)
    h_idx = (n // W) % H
    w_idx = n % W

    w1 = jnp.asarray(p['w1'], f32)     # (W, C)  conv1 weight
    w2 = jnp.asarray(p['w2'], f32)     # (W, H)  conv2 weight
    w3 = jnp.asarray(p['w3'], f32)     # (H, W)  conv3 weight
    w4 = jnp.asarray(p['w4'], f32)     # (H, C)  conv4 weight

    # depthwise-over-C conv weights pre-broadcast to the (C, N) layout
    w1m = w1.T[:, w_idx]               # (C, N): w1[w(n), c]
    w4m = w4.T[:, h_idx]               # (C, N): w4[h(n), c]

    # conv2 (reduce over h) as (C,N)@(N,BW) then (BW,N) broadcast-back
    m_bw = jnp.arange(BW)
    mask2 = (b_idx[:, None] == (m_bw // W)[None, :]) & \
            (w_idx[:, None] == (m_bw % W)[None, :])                     # (N, BW)
    m2 = jnp.where(mask2, w2[(m_bw % W)[None, :], h_idx[:, None]], 0.0)
    e2 = mask2.astype(f32).T                                            # (BW, N)

    # conv3 (reduce over w) as (C,N)@(N,BH) then (BH,N) broadcast-back
    m_bh = jnp.arange(BH)
    mask3 = (b_idx[:, None] == (m_bh // H)[None, :]) & \
            (h_idx[:, None] == (m_bh % H)[None, :])                     # (N, BH)
    m3 = jnp.where(mask3, w3[(m_bh % H)[None, :], w_idx[:, None]], 0.0)
    e3 = mask3.astype(f32).T                                            # (BH, N)

    # combined one-hot lane -> (w | h) selector (transposed form only)
    selwt = (w_idx[None, :] == jnp.arange(W)[:, None]).astype(f32)      # (W, N)
    selht = (h_idx[None, :] == jnp.arange(H)[:, None]).astype(f32)      # (H, N)

    # host-precomputed beta lane-broadcasts of the grouped BNs (order: 1,2,4,3)
    bsh = jnp.concatenate([
        jnp.asarray(p['bt1'], f32)[w_idx][None, :],
        jnp.asarray(p['bt2'], f32)[w_idx][None, :],
        jnp.asarray(p['bt4'], f32)[h_idx][None, :],
        jnp.asarray(p['bt3'], f32)[h_idx][None, :],
    ], axis=0)                                                          # (4, N)

    # ---- rowpack: every lane-width-N operand in one DMA, chunks 8-row aligned
    def pad8(a):
        r = (-a.shape[0]) % 8
        if r:
            a = jnp.concatenate([a, jnp.zeros((r, a.shape[1]), a.dtype)], 0)
        return a

    chunks, off = [], {}
    def add(name, arr):
        off[name] = sum(c.shape[0] for c in chunks)
        chunks.append(pad8(arr))
    add('w14', jnp.concatenate([w1m, w4m], axis=0))        # 2C rows
    add('bsh', bsh)                                        # 4 rows
    add('sel', jnp.concatenate([selwt, selht], axis=0))    # W+H rows
    add('e2', e2)                                          # BW rows
    add('e3', e3)                                          # BH rows
    rowpack = jnp.concatenate(chunks, axis=0)
    O_W14, O_BSH, O_SEL = off['w14'], off['bsh'], off['sel']
    O_E2, O_E3 = off['e2'], off['e3']

    # conv2/conv3 contraction matrices fused along the lane axis
    m23 = jnp.concatenate([m2, m3], axis=1)                # (N, BW+BH)

    # per-channel gamma/beta columns, packed (bn5 tiled 2x for the corr stack)
    col = lambda a: jnp.asarray(a, f32).reshape(-1, 1)
    colpack = jnp.concatenate([
        col(p['bn_g']), col(p['bn_b']),
        jnp.tile(col(p['g5']), (2, 1)), jnp.tile(col(p['bt5']), (2, 1)),
        col(p['g6']), col(p['bt6']),
    ], axis=0)                                             # (8C, 1)

    # grouped-BN 1/count and gamma tables over the combined (W|H) group axis;
    # zeros in the "wrong" half mask out the garbage columns of the fused
    # group-sum matmul.
    inv1, inv2 = 1.0 / BH, 1.0 / (C * BH)   # bn1 (f1), bn2 (f2): per-w counts
    inv4, inv3 = 1.0 / BW, 1.0 / (C * BW)   # bn4 (f4), bn3 (f3): per-h counts
    zw, zh = jnp.zeros((W,), f32), jnp.zeros((H,), f32)
    invbase = jnp.stack([
        jnp.concatenate([jnp.full((W,), inv1, f32), zh]),
        jnp.concatenate([jnp.full((W,), inv2, f32), zh]),
        jnp.concatenate([zw, jnp.full((H,), inv4, f32)]),
        jnp.concatenate([zw, jnp.full((H,), inv3, f32)]),
    ])                                                     # (4, W+H)
    gmat = jnp.stack([
        jnp.concatenate([jnp.asarray(p['g1'], f32), zh]),
        jnp.concatenate([jnp.asarray(p['g2'], f32), zh]),
        jnp.concatenate([zw, jnp.asarray(p['g4'], f32)]),
        jnp.concatenate([zw, jnp.asarray(p['g3'], f32)]),
    ])                                                     # (4, W+H)
    aux = jnp.concatenate([invbase, invbase, gmat], axis=0)  # (12, W+H)

    wa = jnp.asarray(p['wa'], f32)                         # (C, 2C)

    # ------------------------------ kernel --------------------------------- #
    def dot(a, b):
        return jnp.dot(a, b, preferred_element_type=f32)

    def dot_nt(a, b):    # a @ b.T (contract lane axes)
        return lax.dot_general(a, b, (((1,), (1,)), ((), ())),
                               preferred_element_type=f32)

    def bn_rows(y, gamma=None, beta=None):
        """Per-row training-mode BN, decoupled sum / sum-of-squares reductions."""
        inv = 1.0 / y.shape[1]
        m = jnp.sum(y, axis=1, keepdims=True) * inv
        q = jnp.sum(y * y, axis=1, keepdims=True) * inv
        rs = lax.rsqrt(q - m * m + EPS)
        if gamma is not None:
            a = rs * gamma
            return y * a + (beta - m * a)
        return y * rs - m * rs

    def kernel(x_ref, rows_ref, m23_ref, colp_ref, aux_ref, wa_ref,
               out_ref, stat_scr, corr_scr):
        # self.bn : BatchNorm2d(C, affine=True)
        xn = bn_rows(x_ref[...], colp_ref[0:C, :], colp_ref[C:2 * C, :])   # (C,N)

        # conv1 / conv4 (depthwise over C): VPU mul + sublane reduce
        f1 = jnp.sum(xn * rows_ref[O_W14:O_W14 + C, :], axis=0, keepdims=True)
        f4 = jnp.sum(xn * rows_ref[O_W14 + C:O_W14 + 2 * C, :], axis=0,
                     keepdims=True)                                        # (1,N)

        # conv2 / conv3 : one fused MXU contraction, then per-conv broadcast-back
        t23 = dot(xn, m23_ref[...])                                        # (C,BW+BH)
        f2 = dot(t23[:, :BW], rows_ref[O_E2:O_E2 + BW, :])                 # (C,N)
        f3 = dot(t23[:, BW:BW + BH], rows_ref[O_E3:O_E3 + BH, :])          # (C,N)

        # grouped BNs bn1/bn2 (per-w) and bn4/bn3 (per-h), batched:
        # stack [sums; sumsqs] into an (8,N) scratch, one group-sum matmul
        # against the combined [selw; selh] selector, two broadcast-backs.
        stat_scr[0:1, :] = f1
        stat_scr[1:2, :] = jnp.sum(f2, axis=0, keepdims=True)
        stat_scr[2:3, :] = f4
        stat_scr[3:4, :] = jnp.sum(f3, axis=0, keepdims=True)
        stat_scr[4:5, :] = f1 * f1
        stat_scr[5:6, :] = jnp.sum(f2 * f2, axis=0, keepdims=True)
        stat_scr[6:7, :] = f4 * f4
        stat_scr[7:8, :] = jnp.sum(f3 * f3, axis=0, keepdims=True)

        sel = rows_ref[O_SEL:O_SEL + W + H, :]                             # (W+H,N)
        gs = dot_nt(stat_scr[...], sel) * aux_ref[0:8, :]                  # (8,W+H)
        mu = gs[0:4]                                   # [m1 m2 m4 m3] (wrong half 0)
        var = gs[4:8] - mu * mu
        sc = aux_ref[8:12, :] * lax.rsqrt(var + EPS)   # [s1 s2 s4 s3] (wrong half 0)
        bc_mu = dot(mu, sel)                                               # (4,N)
        bc_sc = dot(sc, sel)                                               # (4,N)

        bsh_v = rows_ref[O_BSH:O_BSH + 4, :]           # bt1,bt2,bt4,bt3 lane rows
        f1n = (f1 - bc_mu[0:1]) * bc_sc[0:1] + bsh_v[0:1]
        f2n = (f2 - bc_mu[1:2]) * bc_sc[1:2] + bsh_v[1:2]
        f4n = (f4 - bc_mu[2:3]) * bc_sc[2:3] + bsh_v[2:3]
        f3n = (f3 - bc_mu[3:4]) * bc_sc[3:4] + bsh_v[3:4]

        # corr1 || corr2 as one sublane-full (2C, N) stack
        corr_scr[0:C, :] = f2n * f1n
        corr_scr[C:2 * C, :] = f3n * f4n
        corr = bn_rows(corr_scr[...], colp_ref[2 * C:4 * C, :],
                       colp_ref[4 * C:6 * C, :])       # bn5 (gamma/beta tiled 2x)
        corr = bn_rows(corr)                           # aggregate[0]: BN(2C)
        agg = dot(wa_ref[...], corr)                   # aggregate[1]: 1x1 conv (MXU)

        agg = bn_rows(agg)                             # aggregate[2]: BN(C)
        agg = agg * jax.nn.sigmoid(agg)                # aggregate[3]: SiLU
        gate = jax.nn.sigmoid(agg)                     # activation='sigmoid'

        out_ref[...] = bn_rows(xn * gate, colp_ref[6 * C:7 * C, :],
                               colp_ref[7 * C:8 * C, :])                   # bn6

    inputs = [x2, rowpack, m23, colpack, aux, wa]
    in_specs = [pl.BlockSpec(a.shape, lambda i, nd=a.ndim: (0,) * nd)
                for a in inputs]

    out2 = pl.pallas_call(
        kernel,
        grid=(1,),
        in_specs=in_specs,
        out_specs=pl.BlockSpec((C, N), lambda i: (0, 0)),
        out_shape=jax.ShapeDtypeStruct((C, N), f32),
        scratch_shapes=[pltpu.VMEM((8, N), f32),        # grouped-BN stat stack
                        pltpu.VMEM((2 * C, N), f32)],   # corr1 || corr2 stack
        compiler_params=pltpu.CompilerParams(
            dimension_semantics=("arbitrary",),
            vmem_limit_bytes=32 * 1024 * 1024,
        ),
    )(*inputs)

    # back to the module's NCHW layout
    return out2.reshape(C, B, H, W).transpose(1, 0, 2, 3)


# --------------------- deterministic parameter creation --------------------- #
def init_params(key, C, H, W):
    ks = jax.random.split(key, 24)
    nrm = lambda k, shape, s=0.3: s * jax.random.normal(k, shape, jnp.float32)
    return dict(
        bn_g=1.0 + nrm(ks[0], (C,), 0.1), bn_b=nrm(ks[1], (C,), 0.1),
        w1=nrm(ks[2], (W, C)),  b1=nrm(ks[3], (W,), 0.1),          # conv1 (W,1,C,1)
        g1=1.0 + nrm(ks[4], (W,), 0.1), bt1=nrm(ks[5], (W,), 0.1),
        w2=nrm(ks[6], (W, H)),  b2=nrm(ks[7], (W,), 0.1),          # conv2 (W,1,1,H)
        g2=1.0 + nrm(ks[8], (W,), 0.1), bt2=nrm(ks[9], (W,), 0.1),
        w3=nrm(ks[10], (H, W)), b3=nrm(ks[11], (H,), 0.1),         # conv3 (H,1,W,1)
        g3=1.0 + nrm(ks[12], (H,), 0.1), bt3=nrm(ks[13], (H,), 0.1),
        w4=nrm(ks[14], (H, C)), b4=nrm(ks[15], (H,), 0.1),         # conv4 (H,1,1,C)
        g4=1.0 + nrm(ks[16], (H,), 0.1), bt4=nrm(ks[17], (H,), 0.1),
        g5=1.0 + nrm(ks[18], (C,), 0.1), bt5=nrm(ks[19], (C,), 0.1),
        wa=nrm(ks[20], (C, 2 * C)),                                 # aggregate 1x1 conv
        g6=1.0 + nrm(ks[21], (C,), 0.1), bt6=nrm(ks[22], (C,), 0.1),
    )


# ------------------------- pure-JAX reference model ------------------------- #
def reference_forward(x, p):
    def bn(y, gamma=None, beta=None):
        m = jnp.mean(y, axis=(0, 2, 3), keepdims=True)
        v = jnp.mean((y - m) ** 2, axis=(0, 2, 3), keepdims=True)
        out = (y - m) / jnp.sqrt(v + EPS)
        if gamma is not None:
            out = out * gamma.reshape(1, -1, 1, 1) + beta.reshape(1, -1, 1, 1)
        return out

    x = bn(x, p['bn_g'], p['bn_b'])
    feat_ch = jnp.transpose(x, (0, 3, 1, 2))                        # (B, W, C, H)
    f1 = jnp.einsum('bwch,wc->bwh', feat_ch, p['w1'])[:, :, None, :] \
        + p['b1'][None, :, None, None]
    f1 = bn(f1, p['g1'], p['bt1'])
    f2 = jnp.einsum('bwch,wh->bwc', feat_ch, p['w2'])[:, :, :, None] \
        + p['b2'][None, :, None, None]
    f2 = bn(f2, p['g2'], p['bt2'])
    corr1 = bn(jnp.transpose(jnp.matmul(f2, f1), (0, 2, 3, 1)), p['g5'], p['bt5'])

    feat_wc = jnp.transpose(feat_ch, (0, 3, 1, 2))                  # (B, H, W, C)
    f3 = jnp.einsum('bhwc,hw->bhc', feat_wc, p['w3'])[:, :, None, :] \
        + p['b3'][None, :, None, None]
    f3 = bn(f3, p['g3'], p['bt3'])
    f4 = jnp.einsum('bhwc,hc->bhw', feat_wc, p['w4'])[:, :, :, None] \
        + p['b4'][None, :, None, None]
    f4 = bn(f4, p['g4'], p['bt4'])
    corr2 = bn(jnp.transpose(jnp.matmul(f4, f3), (0, 3, 1, 2)), p['g5'], p['bt5'])

    corr3 = bn(jnp.concatenate([corr1, corr2], axis=1))             # BN(2C), no affine
    agg = bn(jnp.einsum('oc,bchw->bohw', p['wa'], corr3))           # 1x1 conv + BN(C)
    agg = agg * jax.nn.sigmoid(agg)                                 # SiLU
    corr3 = jax.nn.sigmoid(agg)
    return bn(x * corr3, p['g6'], p['bt6'])


if __name__ == "__main__":
    B, C, H, W = 2, 4, 16, 16
    key = jax.random.PRNGKey(0)
    kx, kp = jax.random.split(key)
    x = jax.random.normal(kx, (B, C, H, W), jnp.float32)
    params = init_params(kp, C, H, W)

    out = affine_global_attention_forward(x, params)
    out = jax.block_until_ready(out)
    assert out.shape == (B, C, H, W) and out.dtype == jnp.float32

    ref = jax.block_until_ready(reference_forward(x, params))
    err = float(jnp.max(jnp.abs(out - ref)))
    if not (err == err) or err > 5e-3:   # NaN guard + tolerance
        raise AssertionError(f"Pallas kernel mismatch vs reference: max|diff|={err}")

    print("KERNEL_OK")
</pallas_src>

<mosaic_0001>
module attributes {stable_mosaic.version = 11 : i64} {
  func.func @kernel(%arg0: i32, %arg1: memref<4x512xf32, #tpu.memory_space<vmem>>, %arg2: memref<112x512xf32, #tpu.memory_space<vmem>>, %arg3: memref<512x64xf32, #tpu.memory_space<vmem>>, %arg4: memref<32x1xf32, #tpu.memory_space<vmem>>, %arg5: memref<12x32xf32, #tpu.memory_space<vmem>>, %arg6: memref<4x8xf32, #tpu.memory_space<vmem>>, %arg7: memref<4x512xf32, #tpu.memory_space<vmem>>, %arg8: memref<8x512xf32, #tpu.memory_space<vmem>>, %arg9: memref<8x512xf32, #tpu.memory_space<vmem>>) attributes {dimension_semantics = [#tpu.dimension_semantics<arbitrary>], iteration_bounds = array<i64: 1>, scalar_prefetch = 0 : i64, scratch_operands = 2 : i64, tpu.core_type = #tpu.core_type<tc>, window_params = [{pipeline_mode = #tpu.pipeline_mode<synchronous>, transform_indices = @transform_0, window_bounds = array<i64: 4, 512>}, {pipeline_mode = #tpu.pipeline_mode<synchronous>, transform_indices = @transform_1, window_bounds = array<i64: 112, 512>}, {pipeline_mode = #tpu.pipeline_mode<synchronous>, transform_indices = @transform_2, window_bounds = array<i64: 512, 64>}, {pipeline_mode = #tpu.pipeline_mode<synchronous>, transform_indices = @transform_3, window_bounds = array<i64: 32, 1>}, {pipeline_mode = #tpu.pipeline_mode<synchronous>, transform_indices = @transform_4, window_bounds = array<i64: 12, 32>}, {pipeline_mode = #tpu.pipeline_mode<synchronous>, transform_indices = @transform_5, window_bounds = array<i64: 4, 8>}, {pipeline_mode = #tpu.pipeline_mode<synchronous>, transform_indices = @transform_6, window_bounds = array<i64: 4, 512>}]} {
    %c0 = arith.constant 0 : index
    %c0_0 = arith.constant 0 : index
    %0 = vector.load %arg1[%c0, %c0_0] : memref<4x512xf32, #tpu.memory_space<vmem>>, vector<4x512xf32>
    %c0_1 = arith.constant 0 : index
    %c0_2 = arith.constant 0 : index
    %1 = vector.load %arg4[%c0_1, %c0_2] : memref<32x1xf32, #tpu.memory_space<vmem>>, vector<4x1xf32>
    %c4 = arith.constant 4 : index
    %c0_3 = arith.constant 0 : index
    %2 = vector.load %arg4[%c4, %c0_3] : memref<32x1xf32, #tpu.memory_space<vmem>>, vector<4x1xf32>
    %cst = arith.constant dense<0.000000e+00> : vector<4xf32>
    %3 = vector.multi_reduction <add>, %0, %cst [1] : vector<4x512xf32> to vector<4xf32>
    %4 = vector.shape_cast %3 : vector<4xf32> to vector<4x1xf32>
    %cst_4 = arith.constant 0.001953125 : f32
    %5 = vector.broadcast %cst_4 : f32 to vector<4x1xf32>
    %6 = arith.mulf %4, %5 : vector<4x1xf32>
    %7 = arith.mulf %0, %0 : vector<4x512xf32>
    %cst_5 = arith.constant dense<0.000000e+00> : vector<4xf32>
    %8 = vector.multi_reduction <add>, %7, %cst_5 [1] : vector<4x512xf32> to vector<4xf32>
    %9 = vector.shape_cast %8 : vector<4xf32> to vector<4x1xf32>
    %cst_6 = arith.constant 0.001953125 : f32
    %10 = vector.broadcast %cst_6 : f32 to vector<4x1xf32>
    %11 = arith.mulf %9, %10 : vector<4x1xf32>
    %12 = arith.mulf %6, %6 : vector<4x1xf32>
    %13 = arith.subf %11, %12 : vector<4x1xf32>
    %cst_7 = arith.constant 9.99999974E-6 : f32
    %14 = vector.broadcast %cst_7 : f32 to vector<4x1xf32>
    %15 = arith.addf %13, %14 : vector<4x1xf32>
    %16 = math.rsqrt %15 : vector<4x1xf32>
    %17 = arith.mulf %16, %1 : vector<4x1xf32>
    %18 = vector.broadcast %17 : vector<4x1xf32> to vector<4x512xf32>
    %19 = arith.mulf %0, %18 : vector<4x512xf32>
    %20 = arith.mulf %6, %17 : vector<4x1xf32>
    %21 = arith.subf %2, %20 : vector<4x1xf32>
    %22 = vector.broadcast %21 : vector<4x1xf32> to vector<4x512xf32>
    %23 = arith.addf %19, %22 : vector<4x512xf32>
    %c0_8 = arith.constant 0 : index
    %c0_9 = arith.constant 0 : index
    %24 = vector.load %arg2[%c0_8, %c0_9] : memref<112x512xf32, #tpu.memory_space<vmem>>, vector<4x512xf32>
    %25 = arith.mulf %23, %24 : vector<4x512xf32>
    %cst_10 = arith.constant dense<0.000000e+00> : vector<512xf32>
    %26 = vector.multi_reduction <add>, %25, %cst_10 [0] : vector<4x512xf32> to vector<512xf32>
    %27 = vector.shape_cast %26 : vector<512xf32> to vector<1x512xf32>
    %c4_11 = arith.constant 4 : index
    %c0_12 = arith.constant 0 : index
    %28 = vector.load %arg2[%c4_11, %c0_12] : memref<112x512xf32, #tpu.memory_space<vmem>>, vector<4x512xf32>
    %29 = arith.mulf %23, %28 : vector<4x512xf32>
    %cst_13 = arith.constant dense<0.000000e+00> : vector<512xf32>
    %30 = vector.multi_reduction <add>, %29, %cst_13 [0] : vector<4x512xf32> to vector<512xf32>
    %31 = vector.shape_cast %30 : vector<512xf32> to vector<1x512xf32>
    %c0_14 = arith.constant 0 : index
    %c0_15 = arith.constant 0 : index
    %32 = vector.load %arg3[%c0_14, %c0_15] : memref<512x64xf32, #tpu.memory_space<vmem>>, vector<512x64xf32>
    %cst_16 = arith.constant dense<0.000000e+00> : vector<4x64xf32>
    %33 = tpu.matmul %23, %32, %cst_16 {dimension_numbers = #tpu.dot_dimension_numbers<[1], [0], [0], [1], [0, 0, 1, 1], [], []>} : vector<4x512xf32>, vector<512x64xf32>, vector<4x64xf32> -> vector<4x64xf32>
    %34 = vector.extract_strided_slice %33 {offsets = [0, 0], sizes = [4, 32], strides = [1, 1]} : vector<4x64xf32> to vector<4x32xf32>
    %c48 = arith.constant 48 : index
    %c0_17 = arith.constant 0 : index
    %35 = vector.load %arg2[%c48, %c0_17] : memref<112x512xf32, #tpu.memory_space<vmem>>, vector<32x512xf32>
    %cst_18 = arith.constant dense<0.000000e+00> : vector<4x512xf32>
    %36 = tpu.matmul %34, %35, %cst_18 {dimension_numbers = #tpu.dot_dimension_numbers<[1], [0], [0], [1], [0, 0, 1, 1], [], []>} : vector<4x32xf32>, vector<32x512xf32>, vector<4x512xf32> -> vector<4x512xf32>
    %37 = vector.extract_strided_slice %33 {offsets = [0, 32], sizes = [4, 32], strides = [1, 1]} : vector<4x64xf32> to vector<4x32xf32>
    %c80 = arith.constant 80 : index
    %c0_19 = arith.constant 0 : index
    %38 = vector.load %arg2[%c80, %c0_19] : memref<112x512xf32, #tpu.memory_space<vmem>>, vector<32x512xf32>
    %cst_20 = arith.constant dense<0.000000e+00> : vector<4x512xf32>
    %39 = tpu.matmul %37, %38, %cst_20 {dimension_numbers = #tpu.dot_dimension_numbers<[1], [0], [0], [1], [0, 0, 1, 1], [], []>} : vector<4x32xf32>, vector<32x512xf32>, vector<4x512xf32> -> vector<4x512xf32>
    %c0_21 = arith.constant 0 : index
    %c0_22 = arith.constant 0 : index
    %40 = vector.load %arg8[%c0_21, %c0_22] : memref<8x512xf32, #tpu.memory_space<vmem>>, vector<1x512xf32>
    tpu.vector_store %arg8[%c0_21, %c0_22], %27 {strides = array<i32>} : memref<8x512xf32, #tpu.memory_space<vmem>>, vector<1x512xf32>,
    %cst_23 = arith.constant dense<0.000000e+00> : vector<512xf32>
    %41 = vector.multi_reduction <add>, %36, %cst_23 [0] : vector<4x512xf32> to vector<512xf32>
    %42 = vector.shape_cast %41 : vector<512xf32> to vector<1x512xf32>
    %c1 = arith.constant 1 : index
    %c0_24 = arith.constant 0 : index
    %43 = vector.load %arg8[%c1, %c0_24] : memref<8x512xf32, #tpu.memory_space<vmem>>, vector<1x512xf32>
    tpu.vector_store %arg8[%c1, %c0_24], %42 {strides = array<i32>} : memref<8x512xf32, #tpu.memory_space<vmem>>, vector<1x512xf32>,
    %c2 = arith.constant 2 : index
    %c0_25 = arith.constant 0 : index
    %44 = vector.load %arg8[%c2, %c0_25] : memref<8x512xf32, #tpu.memory_space<vmem>>, vector<1x512xf32>
    tpu.vector_store %arg8[%c2, %c0_25], %31 {strides = array<i32>} : memref<8x512xf32, #tpu.memory_space<vmem>>, vector<1x512xf32>,
    %cst_26 = arith.constant dense<0.000000e+00> : vector<512xf32>
    %45 = vector.multi_reduction <add>, %39, %cst_26 [0] : vector<4x512xf32> to vector<512xf32>
    %46 = vector.shape_cast %45 : vector<512xf32> to vector<1x512xf32>
    %c3 = arith.constant 3 : index
    %c0_27 = arith.constant 0 : index
    %47 = vector.load %arg8[%c3, %c0_27] : memref<8x512xf32, #tpu.memory_space<vmem>>, vector<1x512xf32>
    tpu.vector_store %arg8[%c3, %c0_27], %46 {strides = array<i32>} : memref<8x512xf32, #tpu.memory_space<vmem>>, vector<1x512xf32>,
    %48 = arith.mulf %27, %27 : vector<1x512xf32>
    %c4_28 = arith.constant 4 : index
    %c0_29 = arith.constant 0 : index
    %49 = vector.load %arg8[%c4_28, %c0_29] : memref<8x512xf32, #tpu.memory_space<vmem>>, vector<1x512xf32>
    tpu.vector_store %arg8[%c4_28, %c0_29], %48 {strides = array<i32>} : memref<8x512xf32, #tpu.memory_space<vmem>>, vector<1x512xf32>,
    %50 = arith.mulf %36, %36 : vector<4x512xf32>
    %cst_30 = arith.constant dense<0.000000e+00> : vector<512xf32>
    %51 = vector.multi_reduction <add>, %50, %cst_30 [0] : vector<4x512xf32> to vector<512xf32>
    %52 = vector.shape_cast %51 : vector<512xf32> to vector<1x512xf32>
    %c5 = arith.constant 5 : index
    %c0_31 = arith.constant 0 : index
    %53 = vector.load %arg8[%c5, %c0_31] : memref<8x512xf32, #tpu.memory_space<vmem>>, vector<1x512xf32>
    tpu.vector_store %arg8[%c5, %c0_31], %52 {strides = array<i32>} : memref<8x512xf32, #tpu.memory_space<vmem>>, vector<1x512xf32>,
    %54 = arith.mulf %31, %31 : vector<1x512xf32>
    %c6 = arith.constant 6 : index
    %c0_32 = arith.constant 0 : index
    %55 = vector.load %arg8[%c6, %c0_32] : memref<8x512xf32, #tpu.memory_space<vmem>>, vector<1x512xf32>
    tpu.vector_store %arg8[%c6, %c0_32], %54 {strides = array<i32>} : memref<8x512xf32, #tpu.memory_space<vmem>>, vector<1x512xf32>,
    %56 = arith.mulf %39, %39 : vector<4x512xf32>
    %cst_33 = arith.constant dense<0.000000e+00> : vector<512xf32>
    %57 = vector.multi_reduction <add>, %56, %cst_33 [0] : vector<4x512xf32> to vector<512xf32>
    %58 = vector.shape_cast %57 : vector<512xf32> to vector<1x512xf32>
    %c7 = arith.constant 7 : index
    %c0_34 = arith.constant 0 : index
    %59 = vector.load %arg8[%c7, %c0_34] : memref<8x512xf32, #tpu.memory_space<vmem>>, vector<1x512xf32>
    tpu.vector_store %arg8[%c7, %c0_34], %58 {strides = array<i32>} : memref<8x512xf32, #tpu.memory_space<vmem>>, vector<1x512xf32>,
    %c16 = arith.constant 16 : index
    %c0_35 = arith.constant 0 : index
    %60 = vector.load %arg2[%c16, %c0_35] : memref<112x512xf32, #tpu.memory_space<vmem>>, vector<32x512xf32>
    %c0_36 = arith.constant 0 : index
    %c0_37 = arith.constant 0 : index
    %61 = vector.load %arg8[%c0_36, %c0_37] : memref<8x512xf32, #tpu.memory_space<vmem>>, vector<8x512xf32>
    %cst_38 = arith.constant dense<0.000000e+00> : vector<8x32xf32>
    %62 = tpu.matmul %61, %60, %cst_38 {dimension_numbers = #tpu.dot_dimension_numbers<[1], [1], [0], [0], [0, 0, 1, 0], [], []>} : vector<8x512xf32>, vector<32x512xf32>, vector<8x32xf32> -> vector<8x32xf32>
    %c0_39 = arith.constant 0 : index
    %c0_40 = arith.constant 0 : index
    %63 = vector.load %arg5[%c0_39, %c0_40] : memref<12x32xf32, #tpu.memory_space<vmem>>, vector<8x32xf32>
    %64 = arith.mulf %62, %63 : vector<8x32xf32>
    %65 = vector.extract_strided_slice %64 {offsets = [0, 0], sizes = [4, 32], strides = [1, 1]} : vector<8x32xf32> to vector<4x32xf32>
    %66 = vector.extract_strided_slice %64 {offsets = [4, 0], sizes = [4, 32], strides = [1, 1]} : vector<8x32xf32> to vector<4x32xf32>
    %67 = arith.mulf %65, %65 : vector<4x32xf32>
    %68 = arith.subf %66, %67 : vector<4x32xf32>
    %c8 = arith.constant 8 : index
    %c0_41 = arith.constant 0 : index
    %69 = vector.load %arg5[%c8, %c0_41] : memref<12x32xf32, #tpu.memory_space<vmem>>, vector<4x32xf32>
    %cst_42 = arith.constant 9.99999974E-6 : f32
    %70 = vector.broadcast %cst_42 : f32 to vector<4x32xf32>
    %71 = arith.addf %68, %70 : vector<4x32xf32>
    %72 = math.rsqrt %71 : vector<4x32xf32>
    %73 = arith.mulf %69, %72 : vector<4x32xf32>
    %cst_43 = arith.constant dense<0.000000e+00> : vector<4x512xf32>
    %74 = tpu.matmul %65, %60, %cst_43 {dimension_numbers = #tpu.dot_dimension_numbers<[1], [0], [0], [1], [0, 0, 1, 1], [], []>} : vector<4x32xf32>, vector<32x512xf32>, vector<4x512xf32> -> vector<4x512xf32>
    %cst_44 = arith.constant dense<0.000000e+00> : vector<4x512xf32>
    %75 = tpu.matmul %73, %60, %cst_44 {dimension_numbers = #tpu.dot_dimension_numbers<[1], [0], [0], [1], [0, 0, 1, 1], [], []>} : vector<4x32xf32>, vector<32x512xf32>, vector<4x512xf32> -> vector<4x512xf32>
    %c8_45 = arith.constant 8 : index
    %c0_46 = arith.constant 0 : index
    %76 = vector.load %arg2[%c8_45, %c0_46] : memref<112x512xf32, #tpu.memory_space<vmem>>, vector<4x512xf32>
    %77 = vector.extract_strided_slice %74 {offsets = [0, 0], sizes = [1, 512], strides = [1, 1]} : vector<4x512xf32> to vector<1x512xf32>
    %78 = arith.subf %27, %77 : vector<1x512xf32>
    %79 = vector.extract_strided_slice %75 {offsets = [0, 0], sizes = [1, 512], strides = [1, 1]} : vector<4x512xf32> to vector<1x512xf32>
    %80 = arith.mulf %78, %79 : vector<1x512xf32>
    %81 = vector.extract_strided_slice %76 {offsets = [0, 0], sizes = [1, 512], strides = [1, 1]} : vector<4x512xf32> to vector<1x512xf32>
    %82 = arith.addf %80, %81 : vector<1x512xf32>
    %83 = vector.extract_strided_slice %74 {offsets = [1, 0], sizes = [1, 512], strides = [1, 1]} : vector<4x512xf32> to vector<1x512xf32>
    %84 = vector.broadcast %83 : vector<1x512xf32> to vector<4x512xf32>
    %85 = arith.subf %36, %84 : vector<4x512xf32>
    %86 = vector.extract_strided_slice %75 {offsets = [1, 0], sizes = [1, 512], strides = [1, 1]} : vector<4x512xf32> to vector<1x512xf32>
    %87 = vector.broadcast %86 : vector<1x512xf32> to vector<4x512xf32>
    %88 = arith.mulf %85, %87 : vector<4x512xf32>
    %89 = vector.extract_strided_slice %76 {offsets = [1, 0], sizes = [1, 512], strides = [1, 1]} : vector<4x512xf32> to vector<1x512xf32>
    %90 = vector.broadcast %89 : vector<1x512xf32> to vector<4x512xf32>
    %91 = arith.addf %88, %90 : vector<4x512xf32>
    %92 = vector.extract_strided_slice %74 {offsets = [2, 0], sizes = [1, 512], strides = [1, 1]} : vector<4x512xf32> to vector<1x512xf32>
    %93 = arith.subf %31, %92 : vector<1x512xf32>
    %94 = vector.extract_strided_slice %75 {offsets = [2, 0], sizes = [1, 512], strides = [1, 1]} : vector<4x512xf32> to vector<1x512xf32>
    %95 = arith.mulf %93, %94 : vector<1x512xf32>
    %96 = vector.extract_strided_slice %76 {offsets = [2, 0], sizes = [1, 512], strides = [1, 1]} : vector<4x512xf32> to vector<1x512xf32>
    %97 = arith.addf %95, %96 : vector<1x512xf32>
    %98 = vector.extract_strided_slice %74 {offsets = [3, 0], sizes = [1, 512], strides = [1, 1]} : vector<4x512xf32> to vector<1x512xf32>
    %99 = vector.broadcast %98 : vector<1x512xf32> to vector<4x512xf32>
    %100 = arith.subf %39, %99 : vector<4x512xf32>
    %101 = vector.extract_strided_slice %75 {offsets = [3, 0], sizes = [1, 512], strides = [1, 1]} : vector<4x512xf32> to vector<1x512xf32>
    %102 = vector.broadcast %101 : vector<1x512xf32> to vector<4x512xf32>
    %103 = arith.mulf %100, %102 : vector<4x512xf32>
    %104 = vector.extract_strided_slice %76 {offsets = [3, 0], sizes = [1, 512], strides = [1, 1]} : vector<4x512xf32> to vector<1x512xf32>
    %105 = vector.broadcast %104 : vector<1x512xf32> to vector<4x512xf32>
    %106 = arith.addf %103, %105 : vector<4x512xf32>
    %107 = vector.broadcast %82 : vector<1x512xf32> to vector<4x512xf32>
    %108 = arith.mulf %91, %107 : vector<4x512xf32>
    %c0_47 = arith.constant 0 : index
    %c0_48 = arith.constant 0 : index
    %109 = vector.load %arg9[%c0_47, %c0_48] : memref<8x512xf32, #tpu.memory_space<vmem>>, vector<4x512xf32>
    tpu.vector_store %arg9[%c0_47, %c0_48], %108 {strides = array<i32>} : memref<8x512xf32, #tpu.memory_space<vmem>>, vector<4x512xf32>,
    %110 = vector.broadcast %97 : vector<1x512xf32> to vector<4x512xf32>
    %111 = arith.mulf %106, %110 : vector<4x512xf32>
    %c4_49 = arith.constant 4 : index
    %c0_50 = arith.constant 0 : index
    %112 = vector.load %arg9[%c4_49, %c0_50] : memref<8x512xf32, #tpu.memory_space<vmem>>, vector<4x512xf32>
    tpu.vector_store %arg9[%c4_49, %c0_50], %111 {strides = array<i32>} : memref<8x512xf32, #tpu.memory_space<vmem>>, vector<4x512xf32>,
    %c0_51 = arith.constant 0 : index
    %c0_52 = arith.constant 0 : index
    %113 = vector.load %arg9[%c0_51, %c0_52] : memref<8x512xf32, #tpu.memory_space<vmem>>, vector<8x512xf32>
    %c8_53 = arith.constant 8 : index
    %c0_54 = arith.constant 0 : index
    %114 = vector.load %arg4[%c8_53, %c0_54] : memref<32x1xf32, #tpu.memory_space<vmem>>, vector<8x1xf32>
    %c16_55 = arith.constant 16 : index
    %c0_56 = arith.constant 0 : index
    %115 = vector.load %arg4[%c16_55, %c0_56] : memref<32x1xf32, #tpu.memory_space<vmem>>, vector<8x1xf32>
    %cst_57 = arith.constant dense<0.000000e+00> : vector<8xf32>
    %116 = vector.multi_reduction <add>, %113, %cst_57 [1] : vector<8x512xf32> to vector<8xf32>
    %117 = vector.shape_cast %116 : vector<8xf32> to vector<8x1xf32>
    %cst_58 = arith.constant 0.001953125 : f32
    %118 = vector.broadcast %cst_58 : f32 to vector<8x1xf32>
    %119 = arith.mulf %117, %118 : vector<8x1xf32>
    %120 = arith.mulf %113, %113 : vector<8x512xf32>
    %cst_59 = arith.constant dense<0.000000e+00> : vector<8xf32>
    %121 = vector.multi_reduction <add>, %120, %cst_59 [1] : vector<8x512xf32> to vector<8xf32>
    %122 = vector.shape_cast %121 : vector<8xf32> to vector<8x1xf32>
    %cst_60 = arith.constant 0.001953125 : f32
    %123 = vector.broadcast %cst_60 : f32 to vector<8x1xf32>
    %124 = arith.mulf %122, %123 : vector<8x1xf32>
    %125 = arith.mulf %119, %119 : vector<8x1xf32>
    %126 = arith.subf %124, %125 : vector<8x1xf32>
    %cst_61 = arith.constant 9.99999974E-6 : f32
    %127 = vector.broadcast %cst_61 : f32 to vector<8x1xf32>
    %128 = arith.addf %126, %127 : vector<8x1xf32>
    %129 = math.rsqrt %128 : vector<8x1xf32>
    %130 = arith.mulf %129, %114 : vector<8x1xf32>
    %131 = vector.broadcast %130 : vector<8x1xf32> to vector<8x512xf32>
    %132 = arith.mulf %113, %131 : vector<8x512xf32>
    %133 = arith.mulf %119, %130 : vector<8x1xf32>
    %134 = arith.subf %115, %133 : vector<8x1xf32>
    %135 = vector.broadcast %134 : vector<8x1xf32> to vector<8x512xf32>
    %136 = arith.addf %132, %135 : vector<8x512xf32>
    %cst_62 = arith.constant dense<0.000000e+00> : vector<8xf32>
    %137 = vector.multi_reduction <add>, %136, %cst_62 [1] : vector<8x512xf32> to vector<8xf32>
    %138 = vector.shape_cast %137 : vector<8xf32> to vector<8x1xf32>
    %cst_63 = arith.constant 0.001953125 : f32
    %139 = vector.broadcast %cst_63 : f32 to vector<8x1xf32>
    %140 = arith.mulf %138, %139 : vector<8x1xf32>
    %141 = arith.mulf %136, %136 : vector<8x512xf32>
    %cst_64 = arith.constant dense<0.000000e+00> : vector<8xf32>
    %142 = vector.multi_reduction <add>, %141, %cst_64 [1] : vector<8x512xf32> to vector<8xf32>
    %143 = vector.shape_cast %142 : vector<8xf32> to vector<8x1xf32>
    %cst_65 = arith.constant 0.001953125 : f32
    %144 = vector.broadcast %cst_65 : f32 to vector<8x1xf32>
    %145 = arith.mulf %143, %144 : vector<8x1xf32>
    %146 = arith.mulf %140, %140 : vector<8x1xf32>
    %147 = arith.subf %145, %146 : vector<8x1xf32>
    %cst_66 = arith.constant 9.99999974E-6 : f32
    %148 = vector.broadcast %cst_66 : f32 to vector<8x1xf32>
    %149 = arith.addf %147, %148 : vector<8x1xf32>
    %150 = math.rsqrt %149 : vector<8x1xf32>
    %151 = vector.broadcast %150 : vector<8x1xf32> to vector<8x512xf32>
    %152 = arith.mulf %136, %151 : vector<8x512xf32>
    %153 = arith.mulf %140, %150 : vector<8x1xf32>
    %154 = vector.broadcast %153 : vector<8x1xf32> to vector<8x512xf32>
    %155 = arith.subf %152, %154 : vector<8x512xf32>
    %c0_67 = arith.constant 0 : index
    %c0_68 = arith.constant 0 : index
    %156 = vector.load %arg6[%c0_67, %c0_68] : memref<4x8xf32, #tpu.memory_space<vmem>>, vector<4x8xf32>
    %cst_69 = arith.constant dense<0.000000e+00> : vector<4x512xf32>
    %157 = tpu.matmul %156, %155, %cst_69 {dimension_numbers = #tpu.dot_dimension_numbers<[1], [0], [0], [1], [0, 0, 1, 1], [], []>} : vector<4x8xf32>, vector<8x512xf32>, vector<4x512xf32> -> vector<4x512xf32>
    %cst_70 = arith.constant dense<0.000000e+00> : vector<4xf32>
    %158 = vector.multi_reduction <add>, %157, %cst_70 [1] : vector<4x512xf32> to vector<4xf32>
    %159 = vector.shape_cast %158 : vector<4xf32> to vector<4x1xf32>
    %cst_71 = arith.constant 0.001953125 : f32
    %160 = vector.broadcast %cst_71 : f32 to vector<4x1xf32>
    %161 = arith.mulf %159, %160 : vector<4x1xf32>
    %162 = arith.mulf %157, %157 : vector<4x512xf32>
    %cst_72 = arith.constant dense<0.000000e+00> : vector<4xf32>
    %163 = vector.multi_reduction <add>, %162, %cst_72 [1] : vector<4x512xf32> to vector<4xf32>
    %164 = vector.shape_cast %163 : vector<4xf32> to vector<4x1xf32>
    %cst_73 = arith.constant 0.001953125 : f32
    %165 = vector.broadcast %cst_73 : f32 to vector<4x1xf32>
    %166 = arith.mulf %164, %165 : vector<4x1xf32>
    %167 = arith.mulf %161, %161 : vector<4x1xf32>
    %168 = arith.subf %166, %167 : vector<4x1xf32>
    %cst_74 = arith.constant 9.99999974E-6 : f32
    %169 = vector.broadcast %cst_74 : f32 to vector<4x1xf32>
    %170 = arith.addf %168, %169 : vector<4x1xf32>
    %171 = math.rsqrt %170 : vector<4x1xf32>
    %172 = vector.broadcast %171 : vector<4x1xf32> to vector<4x512xf32>
    %173 = arith.mulf %157, %172 : vector<4x512xf32>
    %174 = arith.mulf %161, %171 : vector<4x1xf32>
    %175 = vector.broadcast %174 : vector<4x1xf32> to vector<4x512xf32>
    %176 = arith.subf %173, %175 : vector<4x512xf32>
    %177 = arith.negf %176 : vector<4x512xf32>
    %178 = math.exp %177 : vector<4x512xf32>
    %cst_75 = arith.constant 1.000000e+00 : f32
    %179 = vector.broadcast %cst_75 : f32 to vector<4x512xf32>
    %180 = arith.addf %179, %178 : vector<4x512xf32>
    %181 = arith.divf %179, %180 : vector<4x512xf32>
    %182 = arith.mulf %176, %181 : vector<4x512xf32>
    %183 = arith.negf %182 : vector<4x512xf32>
    %184 = math.exp %183 : vector<4x512xf32>
    %cst_76 = arith.constant 1.000000e+00 : f32
    %185 = vector.broadcast %cst_76 : f32 to vector<4x512xf32>
    %186 = arith.addf %185, %184 : vector<4x512xf32>
    %187 = arith.divf %185, %186 : vector<4x512xf32>
    %188 = arith.mulf %23, %187 : vector<4x512xf32>
    %c24 = arith.constant 24 : index
    %c0_77 = arith.constant 0 : index
    %189 = vector.load %arg4[%c24, %c0_77] : memref<32x1xf32, #tpu.memory_space<vmem>>, vector<4x1xf32>
    %c28 = arith.constant 28 : index
    %c0_78 = arith.constant 0 : index
    %190 = vector.load %arg4[%c28, %c0_78] : memref<32x1xf32, #tpu.memory_space<vmem>>, vector<4x1xf32>
    %cst_79 = arith.constant dense<0.000000e+00> : vector<4xf32>
    %191 = vector.multi_reduction <add>, %188, %cst_79 [1] : vector<4x512xf32> to vector<4xf32>
    %192 = vector.shape_cast %191 : vector<4xf32> to vector<4x1xf32>
    %cst_80 = arith.constant 0.001953125 : f32
    %193 = vector.broadcast %cst_80 : f32 to vector<4x1xf32>
    %194 = arith.mulf %192, %193 : vector<4x1xf32>
    %195 = arith.mulf %188, %188 : vector<4x512xf32>
    %cst_81 = arith.constant dense<0.000000e+00> : vector<4xf32>
    %196 = vector.multi_reduction <add>, %195, %cst_81 [1] : vector<4x512xf32> to vector<4xf32>
    %197 = vector.shape_cast %196 : vector<4xf32> to vector<4x1xf32>
    %cst_82 = arith.constant 0.001953125 : f32
    %198 = vector.broadcast %cst_82 : f32 to vector<4x1xf32>
    %199 = arith.mulf %197, %198 : vector<4x1xf32>
    %200 = arith.mulf %194, %194 : vector<4x1xf32>
    %201 = arith.subf %199, %200 : vector<4x1xf32>
    %cst_83 = arith.constant 9.99999974E-6 : f32
    %202 = vector.broadcast %cst_83 : f32 to vector<4x1xf32>
    %203 = arith.addf %201, %202 : vector<4x1xf32>
    %204 = math.rsqrt %203 : vector<4x1xf32>
    %205 = arith.mulf %204, %189 : vector<4x1xf32>
    %206 = vector.broadcast %205 : vector<4x1xf32> to vector<4x512xf32>
    %207 = arith.mulf %188, %206 : vector<4x512xf32>
    %208 = arith.mulf %194, %205 : vector<4x1xf32>
    %209 = arith.subf %190, %208 : vector<4x1xf32>
    %210 = vector.broadcast %209 : vector<4x1xf32> to vector<4x512xf32>
    %211 = arith.addf %207, %210 : vector<4x512xf32>
    %c0_84 = arith.constant 0 : index
    %c0_85 = arith.constant 0 : index
    %212 = vector.load %arg7[%c0_84, %c0_85] : memref<4x512xf32, #tpu.memory_space<vmem>>, vector<4x512xf32>
    tpu.vector_store %arg7[%c0_84, %c0_85], %211 {strides = array<i32>} : memref<4x512xf32, #tpu.memory_space<vmem>>, vector<4x512xf32>,
    return
  }
  func.func @transform_0(%arg0: i32) -> (i32, i32) {
    %c0_i32 = arith.constant 0 : i32
    %c0_i32_0 = arith.constant 0 : i32
    %c0_i32_1 = arith.constant 0 : i32
    return %c0_i32, %c0_i32_0 : i32, i32
  }
  func.func @transform_1(%arg0: i32) -> (i32, i32) {
    %c0_i32 = arith.constant 0 : i32
    %c0_i32_0 = arith.constant 0 : i32
    %c0_i32_1 = arith.constant 0 : i32
    return %c0_i32, %c0_i32_0 : i32, i32
  }
  func.func @transform_2(%arg0: i32) -> (i32, i32) {
    %c0_i32 = arith.constant 0 : i32
    %c0_i32_0 = arith.constant 0 : i32
    %c0_i32_1 = arith.constant 0 : i32
    return %c0_i32, %c0_i32_0 : i32, i32
  }
  func.func @transform_3(%arg0: i32) -> (i32, i32) {
    %c0_i32 = arith.constant 0 : i32
    %c0_i32_0 = arith.constant 0 : i32
    %c0_i32_1 = arith.constant 0 : i32
    return %c0_i32, %c0_i32_0 : i32, i32
  }
  func.func @transform_4(%arg0: i32) -> (i32, i32) {
    %c0_i32 = arith.constant 0 : i32
    %c0_i32_0 = arith.constant 0 : i32
    %c0_i32_1 = arith.constant 0 : i32
    return %c0_i32, %c0_i32_0 : i32, i32
  }
  func.func @transform_5(%arg0: i32) -> (i32, i32) {
    %c0_i32 = arith.constant 0 : i32
    %c0_i32_0 = arith.constant 0 : i32
    %c0_i32_1 = arith.constant 0 : i32
    return %c0_i32, %c0_i32_0 : i32, i32
  }
  func.func @transform_6(%arg0: i32) -> (i32, i32) {
    %c0_i32 = arith.constant 0 : i32
    %c0_i32_0 = arith.constant 0 : i32
    %c0_i32_1 = arith.constant 0 : i32
    return %c0_i32, %c0_i32_0 : i32, i32
  }
}

</mosaic_0001>

<bundles_post_ra>
// kernel: tpu_custom_call.1
= control target key start
LH: loop header
LB: loop body
LE: loop exit
PB: predicated region body
PF: predicated region fallthrough
CT: control target
= control target key end

     0   :  { %vm34_vm0 = vcmask 1043456   ;;  %s3321_s0 = inlined_call_operand.vmem [shape: f32[4,512], index: 0, kind: input, shape index: {}]   ;;  %s3322_s1 = inlined_call_operand.vmem [shape: f32[112,512], index: 1, kind: input, shape index: {}]   ;;  %s3323_s2 = inlined_call_operand.vmem [shape: f32[512,64], index: 2, kind: input, shape index: {}]   ;;  %s3324_s3 = inlined_call_operand.vmem [shape: f32[32,1], index: 3, kind: input, shape index: {}]   ;;  %s3325_s4 = inlined_call_operand.vmem [shape: f32[12,32], index: 4, kind: input, shape index: {}]   ;;  %s3326_s5 = inlined_call_operand.vmem [shape: f32[4,8], index: 5, kind: input, shape index: {}]   ;;  %s3327_s6 = inlined_call_operand.hbm [shape: f32[4,512], index: 6, kind: output, shape index: {}]  }
   0x1   :  { %v2556_v0 = vld [vmem:[%s3321_s0] sm:$0xff]  ;;  %v2561_v1 = vld [vmem:[%s3321_s0 + $0x8] sm:$0xff] }
   0x2   :  { %v30_v2 = vcombine.high %v2556_v0, %v2556_v0  ;;  %v31_v3 = vcombine.high %v2561_v1, %v2561_v1  ;;  %v35_v4 = vsel %vm34_vm0, %v2556_v0, 0.0  ;;  %v45_v5 = vmul.f32 %v2556_v0, %v2556_v0 }
   0x3   :  { %v46_v6 = vmul.f32 %v2561_v1, %v2561_v1  ;;  %v38_v8 = vsel %vm34_vm0, %v2561_v1, 0.0 }
   0x4   :  { %v36_v7 = vsel %vm34_vm0, %v30_v2, 0.0  ;;  %v49_v10 = vcombine.high %v45_v5, %v45_v5  ;;  %v53_v12 = vsel %vm34_vm0, %v45_v5, 0.0 }
   0x5   :  { %v37_v9 = vadd.f32 %v36_v7, %v35_v4  ;;  %v50_v11 = vcombine.high %v46_v6, %v46_v6 }
   0x6   :  { %11 = vsyncpa [#allocation5], 0  ;;  %v40_v13 = vsel %vm34_vm0, %v31_v3, 0.0  ;;  %v54_v15 = vsel %vm34_vm0, %v49_v10, 0.0  ;;  %v56_v16 = vsel %vm34_vm0, %v46_v6, 0.0  ;;  %v2512_v22 = vmov 0  }
   0x7   :  { %v39_v14 = vadd.f32 %v38_v8, %v37_v9  ;;  %v55_v17 = vadd.f32 %v54_v15, %v53_v12  ;;  %v58_v19 = vsel %vm34_vm0, %v50_v11, 0.0  ;;  %2436 = vset.pattern.permute.xlu1 %v2512_v22  ;;  %2437 = vset.pattern.permute.xlu0 %v2512_v22  ;;  %v210_v23 = vld [vmem:[%s3323_s2 + $0x80] sm:$0xff]  ;;  %v211_v24 = vld [vmem:[%s3323_s2 + $0x88] sm:$0xff]  ;;  %v212_v34 = vld [vmem:[%s3323_s2 + $0x90] sm:$0xff]  ;;  %vm420_vm2 = vcmask 261120   ;;  %s2516_s25 = smov 96  }
   0x8   :  { %v242_v25 = vld [vmem:[%s3323_s2 + $0x180] sm:$0xff]  ;;  %v2284_v26 = vpack.c.bf16 %v211_v24, %v210_v23  ;;  %v243_v27 = vld [vmem:[%s3323_s2 + $0x188] sm:$0xff]  ;;  %v213_v36 = vld [vmem:[%s3323_s2 + $0x98] sm:$0xff]  ;;  %vm1864_vm3 = vcmask 64512  }
   0x9   :  { %v41_v18 = vadd.f32 %v40_v13, %v39_v14  ;;  %v57_v20 = vadd.f32 %v56_v16, %v55_v17  ;;  %v194_v28 = vld [vmem:[%s3323_s2] sm:$0xff]  ;;  %v195_v29 = vld [vmem:[%s3323_s2 + $0x8] sm:$0xff]  ;;  %v2316_v30 = vpack.c.bf16 %v243_v27, %v242_v25  ;;  %v244_v37 = vld [vmem:[%s3323_s2 + $0x190] sm:$0xff]  ;;  %v2288_v39 = vpack.c.bf16 %v213_v36, %v212_v34 }
   0xa   :  { %v2286_v31 = vpack.c.bf16 %v195_v29, %v194_v28  ;;  %v226_v32 = vld [vmem:[%s3323_s2 + $0x100] sm:$0xff]  ;;  %v227_v33 = vld [vmem:[%s3323_s2 + $0x108] sm:$0xff]  ;;  %2285 = vmatprep.subr.bf16.mxu0 %v2284_v26  ;;  %v245_v38 = vld [vmem:[%s3323_s2 + $0x198] sm:$0xff] }
   0xb   :  { %42 = vadd.xlane.f32.xlu0 %v41_v18  ;;  %v59_v21 = vadd.f32 %v58_v19, %v57_v20  ;;  %v2318_v35 = vpack.c.bf16 %v227_v33, %v226_v32  ;;  %2317 = vmatprep.subr.bf16.mxu1 %v2316_v30  ;;  %v2320_v40 = vpack.c.bf16 %v245_v38, %v244_v37  ;;  %v196_v41 = vld [vmem:[%s3323_s2 + $0x10] sm:$0xff]  ;;  %v197_v42 = vld [vmem:[%s3323_s2 + $0x18] sm:$0xff]  ;;  %v214_v46 = vld [vmem:[%s3323_s2 + $0xa0] sm:$0xff] }
   0xc   :  { %2287 = vmatpush3.bf16.msra.mxu0 %v2286_v31  ;;  %v228_v43 = vld [vmem:[%s3323_s2 + $0x110] sm:$0xff]  ;;  %v2290_v44 = vpack.c.bf16 %v197_v42, %v196_v41  ;;  %v229_v45 = vld [vmem:[%s3323_s2 + $0x118] sm:$0xff]  ;;  %v215_v47 = vld [vmem:[%s3323_s2 + $0xa8] sm:$0xff] }
   0xd   :  { %2319 = vmatpush3.bf16.msra.mxu1 %v2318_v35  ;;  %2289 = vmatprep.subr.bf16.mxu0 %v2288_v39  ;;  %v2322_v48 = vpack.c.bf16 %v229_v45, %v228_v43  ;;  %v2292_v49 = vpack.c.bf16 %v215_v47, %v214_v46  ;;  %v246_v50 = vld [vmem:[%s3323_s2 + $0x1a0] sm:$0xff]  ;;  %v247_v51 = vld [vmem:[%s3323_s2 + $0x1a8] sm:$0xff]  ;;  %v216_v58 = vld [vmem:[%s3323_s2 + $0xb0] sm:$0xff] }
   0xe   :  { %2321 = vmatprep.subr.bf16.mxu1 %v2320_v40  ;;  %v198_v52 = vld [vmem:[%s3323_s2 + $0x20] sm:$0xff]  ;;  %v2324_v53 = vpack.c.bf16 %v247_v51, %v246_v50  ;;  %v199_v54 = vld [vmem:[%s3323_s2 + $0x28] sm:$0xff]  ;;  %v217_v59 = vld [vmem:[%s3323_s2 + $0xb8] sm:$0xff] }
   0xf   :  { %60 = vadd.xlane.f32.xlu0 %v59_v21  ;;  %v230_v55 = vld [vmem:[%s3323_s2 + $0x120] sm:$0xff]  ;;  %v231_v56 = vld [vmem:[%s3323_s2 + $0x128] sm:$0xff]  ;;  %v2294_v57 = vpack.c.bf16 %v199_v54, %v198_v52  ;;  %v248_v60 = vld [vmem:[%s3323_s2 + $0x1b0] sm:$0xff]  ;;  %v2296_v62 = vpack.c.bf16 %v217_v59, %v216_v58 }
  0x10   :  { %2291 = vmatpush3.bf16.msra.mxu0 %v2290_v44  ;;  %v2326_v61 = vpack.c.bf16 %v231_v56, %v230_v55  ;;  %v249_v63 = vld [vmem:[%s3323_s2 + $0x1b8] sm:$0xff]  ;;  %v200_v2 = vld [vmem:[%s3323_s2 + $0x30] sm:$0xff]  ;;  %v218_v7 = vld [vmem:[%s3323_s2 + $0xc0] sm:$0xff] }
  0x11   :  { %2323 = vmatpush3.bf16.msra.mxu1 %v2322_v48  ;;  %2293 = vmatprep.subr.bf16.mxu0 %v2292_v49  ;;  %v201_v3 = vld [vmem:[%s3323_s2 + $0x38] sm:$0xff]  ;;  %v2328_v4 = vpack.c.bf16 %v249_v63, %v248_v60  ;;  %v232_v5 = vld [vmem:[%s3323_s2 + $0x130] sm:$0xff]  ;;  %v219_v8 = vld [vmem:[%s3323_s2 + $0xc8] sm:$0xff] }
  0x12   :  { %2325 = vmatprep.subr.bf16.mxu1 %v2324_v53  ;;  %v233_v6 = vld [vmem:[%s3323_s2 + $0x138] sm:$0xff]  ;;  %v250_v9 = vld [vmem:[%s3323_s2 + $0x1c0] sm:$0xff]  ;;  %v251_v10 = vld [vmem:[%s3323_s2 + $0x1c8] sm:$0xff]  ;;  %v2298_v11 = vpack.c.bf16 %v201_v3, %v200_v2  ;;  %v2300_v13 = vpack.c.bf16 %v219_v8, %v218_v7 }
  0x13   :  { %v2330_v12 = vpack.c.bf16 %v233_v6, %v232_v5  ;;  %v202_v14 = vld [vmem:[%s3323_s2 + $0x40] sm:$0xff]  ;;  %v203_v15 = vld [vmem:[%s3323_s2 + $0x48] sm:$0xff]  ;;  %v2332_v17 = vpack.c.bf16 %v251_v10, %v250_v9  ;;  %v220_v19 = vld [vmem:[%s3323_s2 + $0xd0] sm:$0xff] }
  0x14   :  { %2295 = vmatpush3.bf16.msra.mxu0 %v2294_v57  ;;  %v234_v16 = vld [vmem:[%s3323_s2 + $0x140] sm:$0xff]  ;;  %v235_v18 = vld [vmem:[%s3323_s2 + $0x148] sm:$0xff]  ;;  %v221_v20 = vld [vmem:[%s3323_s2 + $0xd8] sm:$0xff]  ;;  %v2302_v23 = vpack.c.bf16 %v203_v15, %v202_v14  ;;  %v2513_v14 = vmov 839922192  }
  0x15   :  { %2327 = vmatpush3.bf16.msra.mxu1 %v2326_v61  ;;  %2297 = vmatprep.subr.bf16.mxu0 %v2296_v62  ;;  %v252_v21 = vld [vmem:[%s3323_s2 + $0x1d0] sm:$0xff]  ;;  %v253_v22 = vld [vmem:[%s3323_s2 + $0x1d8] sm:$0xff]  ;;  %v2334_v24 = vpack.c.bf16 %v235_v18, %v234_v16  ;;  %v2304_v25 = vpack.c.bf16 %v221_v20, %v220_v19  ;;  %v26_v34 = vld [vmem:[%s3324_s3] sm:$0xf]  ;;  %v73_v15 = vunpack.c.l.s4 %v2513_v14  ;;  %v75_v16 = vlaneseq }
  0x16   :  { %2329 = vmatprep.subr.bf16.mxu1 %v2328_v4  ;;  %v2336_v26 = vpack.c.bf16 %v253_v22, %v252_v21  ;;  %v204_v36 = vld [vmem:[%s3323_s2 + $0x50] sm:$0xff]  ;;  %v205_v37 = vld [vmem:[%s3323_s2 + $0x58] sm:$0xff]  ;;  %v27_v42 = vld [vmem:[%s3324_s3 + $0x4] sm:$0xf]  ;;  %v2514_v21 = vmov 1966171168  }
  0x17   :  { %v236_v38 = vld [vmem:[%s3323_s2 + $0x150] sm:$0xff]  ;;  %v2306_v40 = vpack.c.bf16 %v205_v37, %v204_v36  ;;  %v237_v41 = vld [vmem:[%s3323_s2 + $0x158] sm:$0xff]  ;;  %v222_v45 = vld [vmem:[%s3323_s2 + $0xe0] sm:$0xff]  ;;  %v2792_v18 = vshrl.u32 %v75_v16, 7  ;;  %v735_v22 = vunpack.c.l.s4 %v2514_v21  ;;  %vm2893_vm1 = vcmp.lt.s32.totalorder %v75_v16, 512 }
  0x18   :  { %2299 = vmatpush3.bf16.msra.mxu0 %v2298_v11  ;;  %v2338_v43 = vpack.c.bf16 %v237_v41, %v236_v38  ;;  %v223_v46 = vld [vmem:[%s3323_s2 + $0xe8] sm:$0xff]  ;;  %v254_v47 = vld [vmem:[%s3323_s2 + $0x1e0] sm:$0xff]  ;;  %v224_v58 = vld [vmem:[%s3323_s2 + $0xf0] sm:$0xff] }
  0x19   :  { %2331 = vmatpush3.bf16.msra.mxu1 %v2330_v12  ;;  %2301 = vmatprep.subr.bf16.mxu0 %v2300_v13  ;;  %v2308_v48 = vpack.c.bf16 %v223_v46, %v222_v45  ;;  %v255_v49 = vld [vmem:[%s3323_s2 + $0x1e8] sm:$0xff]  ;;  %v206_v52 = vld [vmem:[%s3323_s2 + $0x60] sm:$0xff]  ;;  %v225_v59 = vld [vmem:[%s3323_s2 + $0xf8] sm:$0xff] }
  0x1a   :  { %2333 = vmatprep.subr.bf16.mxu1 %v2332_v17  ;;  %v2340_v51 = vpack.c.bf16 %v255_v49, %v254_v47  ;;  %v207_v53 = vld [vmem:[%s3323_s2 + $0x68] sm:$0xff]  ;;  %v238_v54 = vld [vmem:[%s3323_s2 + $0x160] sm:$0xff]  ;;  %v256_v60 = vld [vmem:[%s3323_s2 + $0x1f0] sm:$0xff]  ;;  %v2312_v61 = vpack.c.bf16 %v225_v59, %v224_v58  ;;  %v74_v17 = vunpack.c.0.s8 %v73_v15 }
  0x1b   :  { %v2310_v55 = vpack.c.bf16 %v207_v53, %v206_v52  ;;  %v239_v56 = vld [vmem:[%s3323_s2 + $0x168] sm:$0xff]  ;;  %v257_v62 = vld [vmem:[%s3323_s2 + $0x1f8] sm:$0xff]  ;;  %v208_v63 = vld [vmem:[%s3323_s2 + $0x70] sm:$0xff] }
  0x1c   :  { %2303 = vmatpush3.bf16.msra.mxu0 %v2302_v23  ;;  %v2342_v57 = vpack.c.bf16 %v239_v56, %v238_v54  ;;  %v209_v2 = vld [vmem:[%s3323_s2 + $0x78] sm:$0xff]  ;;  %v2344_v3 = vpack.c.bf16 %v257_v62, %v256_v60  ;;  %v240_v5 = vld [vmem:[%s3323_s2 + $0x170] sm:$0xff]  ;;  %v405_v8 = vld [vmem:[%s3322_s1 + $0xc8] sm:$0xff]  ;;  %v2795_v19 = vsub.s32 %v74_v17, %v2792_v18 }
  0x1d   :  { %2335 = vmatpush3.bf16.msra.mxu1 %v2334_v24  ;;  %2305 = vmatprep.subr.bf16.mxu0 %v2304_v25  ;;  %v2314_v4 = vpack.c.bf16 %v209_v2, %v208_v63  ;;  %v241_v6 = vld [vmem:[%s3323_s2 + $0x178] sm:$0xff]  ;;  %v409_v9 = vld [vmem:[%s3322_s1 + $0xe8] sm:$0xff]  ;;  %v736_v25 = vunpack.c.0.s8 %v735_v22  ;;  %v410_v36 = vld [vmem:[%s3322_s1 + $0xf0] sm:$0xff] }
  0x1e   :  { %2337 = vmatprep.subr.bf16.mxu1 %v2336_v26  ;;  %v2346_v7 = vpack.c.bf16 %v241_v6, %v240_v5  ;;  %v407_v10 = vld [vmem:[%s3322_s1 + $0xd8] sm:$0xff]  ;;  %v2348_v11 = vpack.c.bf16 %v409_v9, %v405_v8  ;;  %v2440_v24 = vld [vmem:[%s3322_s1] ss:$8 sps:$4 sm:$0xff]  }
  0x1f   :  { %v411_v12 = vld [vmem:[%s3322_s1 + $0xf8] sm:$0xff]  ;;  %v2830_v37 = vsub.s32 %v736_v25, %v2792_v18 }
  0x20   :  { %2307 = vmatpush3.bf16.msra.mxu0 %v2306_v40  ;;  %v2356_v13 = vpack.c.bf16 %v411_v12, %v407_v10 }
  0x21   :  { %2339 = vmatpush3.bf16.msra.mxu1 %v2338_v43  ;;  %2309 = vmatprep.subr.bf16.mxu0 %v2308_v48 }
  0x22   :  { %2341 = vmatprep.subr.bf16.mxu1 %v2340_v51 }
  0x24   :  { %2311 = vmatpush3.bf16.msra.mxu0 %v2310_v55 }
  0x25   :  { %2343 = vmatpush3.bf16.msra.mxu1 %v2342_v57  ;;  %2313 = vmatprep.subr.bf16.mxu0 %v2312_v61 }
  0x26   :  { %2345 = vmatprep.subr.bf16.mxu1 %v2344_v3 }
  0x28   :  { %2315 = vmatpush3.bf16.msra.mxu0 %v2314_v4 }
  0x29   :  { %2347 = vmatpush3.bf16.msra.mxu1 %v2346_v7  ;;  %2349 = vmatprep.subr.bf16.mxu0 %v2348_v11 }
  0x2a   :  { %2357 = vmatprep.subr.bf16.mxu1 %v2356_v13 }
  0x98   :  { %v43_v27 = vpop.xlane.xlu0 %42 }
  0x99   :  { %v44_v28 = vmul.f32 0.001953125, %v43_v27 }
  0x9b   :  { %v63_v30 = vmul.f32 %v44_v28, %v44_v28 }
  0x9c   :  { %v61_v29 = vpop.xlane.xlu0 %60 }
  0x9d   :  { %v62_v31 = vmul.f32 0.001953125, %v61_v29  ;;  %v2441_v29 = vld [vmem:[%s3322_s1 + $0x10] ss:$8 sps:$4 sm:$0xff]  }
  0x9f   :  { %v64_v32 = vsub.f32 %v62_v31, %v63_v30  ;;  %v2442_v30 = vld [vmem:[%s3322_s1 + $0x4] ss:$8 sps:$4 sm:$0xff]   ;;  %v2443_v31 = vld [vmem:[%s3322_s1 + $0x14] ss:$8 sps:$4 sm:$0xff]  }
  0xa1   :  { %v65_v33 = vadd.f32 1e-05, %v64_v32 }
  0xa3   :  { %2444 = vrsqrt.f32 %v65_v33 }
  0xad   :  { %v2445_v35 = vpop.eup %2444 }
  0xae   :  { %v67_v39 = vmul.f32 %v2445_v35, %v26_v34  ;;  %v408_v34 = vld [vmem:[%s3322_s1 + $0xe0] sm:$0xff]  ;;  %v406_v35 = vld [vmem:[%s3322_s1 + $0xd0] sm:$0xff] }
  0xaf   :  { %v2358_v45 = vpack.c.bf16 %v410_v36, %v406_v35 }
  0xb0   :  { %70 = vperm.xlu1 %2436, %v67_v39   ;;  %v82_v44 = vmul.f32 %v67_v39, %v44_v28 }
  0xb2   :  { %v83_v50 = vsub.f32 %v27_v42, %v82_v44 }
  0xb4   :  { %86 = vperm.xlu1 %2436, %v83_v50  }
 0x12f   :  { %v71_v20 = vpop.permute.xlu1 %70 }
 0x130   :  { %v78_v23 = vrot.slane %v71_v20, %v2795_v19 }
 0x132   :  { %v80_v27 = vmul.f32 %v78_v23, %v2556_v0  ;;  %v81_v28 = vmul.f32 %v78_v23, %v2561_v1  ;;  %v404_v0 = vld [vmem:[%s3322_s1 + $0xc0] sm:$0xff] }
 0x133   :  { %v87_v26 = vpop.permute.xlu1 %86  ;;  %v2350_v44 = vpack.c.bf16 %v408_v34, %v404_v0 }
 0x134   :  { %v94_v32 = vrot.slane %v87_v26, %v2795_v19 }
 0x136   :  { %v2816_v33 = vadd.f32 %v94_v32, %v80_v27  ;;  %v2818_v1 = vadd.f32 %v94_v32, %v81_v28 }
 0x138   :  { %v110_v38 = vmul.f32 %v2440_v24, %v2816_v33  ;;  %v111_v39 = vmul.f32 %v2441_v29, %v2818_v1  ;;  %v158_v40 = vmul.f32 %v2442_v30, %v2816_v33  ;;  %v159_v41 = vmul.f32 %v2443_v31, %v2818_v1 }
 0x139   :  { %v260_v42 = vcombine.high %v2816_v33, %v2816_v33  ;;  %v261_v43 = vcombine.high %v2818_v1, %v2818_v1 }
 0x13a   :  { %v114_v46 = vcombine.high %v110_v38, %v110_v38  ;;  %v115_v47 = vcombine.high %v111_v39, %v111_v39  ;;  %v118_v48 = vsel %vm34_vm0, %v110_v38, 0.0  ;;  %v132_v49 = vsel %vm34_vm0, %v111_v39, 0.0 }
 0x13b   :  { %v119_v50 = vrot.slane %v118_v48, 4  ;;  %v133_v51 = vrot.slane %v132_v49, 4  ;;  %v162_v52 = vcombine.high %v158_v40, %v158_v40  ;;  %v163_v53 = vcombine.high %v159_v41, %v159_v41  ;;  %328 = vmatprep.mubr.f32.mxu0 %v260_v42  ;;  %398 = vmatprep.mubr.f32.mxu1 %v261_v43 }
 0x13c   :  { %v125_v54 = vsel %vm34_vm0, %v114_v46, 0.0  ;;  %v139_v55 = vsel %vm34_vm0, %v115_v47, 0.0  ;;  %v166_v56 = vsel %vm34_vm0, %v158_v40, 0.0  ;;  %v180_v57 = vsel %vm34_vm0, %v159_v41, 0.0  ;;  %329 = vmatmul.mubr.f32.vlgmr.msra.gmra.mrb[0].mxu0 %v2816_v33  ;;  %399 = vmatmul.mubr.f32.vlgmr.msra.gmra.mrb[0].mxu1 %v2818_v1 }
 0x13d   :  { %v120_v58 = vadd.f32 %v119_v50, %v118_v48  ;;  %v126_v59 = vrot.slane %v125_v54, 4  ;;  %v134_v60 = vadd.f32 %v133_v51, %v132_v49  ;;  %v140_v61 = vrot.slane %v139_v55, 4  ;;  %2351 = vmatpush1.bf16.msra.mxu0 %v2350_v44  ;;  %2359 = vmatpush1.bf16.msra.mxu1 %v2358_v45 }
 0x13e   :  { %v167_v62 = vrot.slane %v166_v56, 4  ;;  %v173_v63 = vsel %vm34_vm0, %v162_v52, 0.0  ;;  %v181_v2 = vrot.slane %v180_v57, 4  ;;  %v187_v3 = vsel %vm34_vm0, %v163_v53, 0.0 }
 0x13f   :  { %v121_v4 = vrot.slane %v120_v58, 2  ;;  %v127_v5 = vadd.f32 %v126_v59, %v125_v54  ;;  %v135_v6 = vrot.slane %v134_v60, 2  ;;  %v141_v7 = vadd.f32 %v140_v61, %v139_v55 }
 0x140   :  { %v168_v8 = vadd.f32 %v167_v62, %v166_v56  ;;  %v174_v9 = vrot.slane %v173_v63, 4  ;;  %v182_v10 = vadd.f32 %v181_v2, %v180_v57  ;;  %v188_v11 = vrot.slane %v187_v3, 4 }
 0x141   :  { %v122_v12 = vadd.f32 %v121_v4, %v120_v58  ;;  %v128_v13 = vrot.slane %v127_v5, 2  ;;  %v136_v14 = vadd.f32 %v135_v6, %v134_v60  ;;  %v142_v15 = vrot.slane %v141_v7, 2 }
 0x142   :  { %v169_v17 = vrot.slane %v168_v8, 2  ;;  %v175_v20 = vadd.f32 %v174_v9, %v173_v63  ;;  %v183_v21 = vrot.slane %v182_v10, 2  ;;  %v189_v22 = vadd.f32 %v188_v11, %v187_v3 }
 0x143   :  { %v123_v23 = vrot.slane %v122_v12, 1  ;;  %v129_v24 = vadd.f32 %v128_v13, %v127_v5  ;;  %v137_v25 = vrot.slane %v136_v14, 1  ;;  %v143_v26 = vadd.f32 %v142_v15, %v141_v7 }
 0x144   :  { %v170_v27 = vadd.f32 %v169_v17, %v168_v8  ;;  %v176_v28 = vrot.slane %v175_v20, 2  ;;  %v184_v29 = vadd.f32 %v183_v21, %v182_v10  ;;  %v190_v30 = vrot.slane %v189_v22, 2  ;;  %v413_v21 = vld [vmem:[%s3322_s1 + $0x108] sm:$0xff] }
 0x145   :  { %v2850_v31 = vadd.f32 %v123_v23, %v122_v12  ;;  %v130_v32 = vrot.slane %v129_v24, 1  ;;  %v2852_v0 = vadd.f32 %v137_v25, %v136_v14  ;;  %v144_v34 = vrot.slane %v143_v26, 1  ;;  %v415_v23 = vld [vmem:[%s3322_s1 + $0x118] sm:$0xff] }
 0x146   :  { %v171_v35 = vrot.slane %v170_v27, 1  ;;  %v177_v36 = vadd.f32 %v176_v28, %v175_v20  ;;  %v185_v38 = vrot.slane %v184_v29, 1  ;;  %v191_v39 = vadd.f32 %v190_v30, %v189_v22  ;;  %v417_v22 = vld [vmem:[%s3322_s1 + $0x128] sm:$0xff]  ;;  %v419_v25 = vld [vmem:[%s3322_s1 + $0x138] sm:$0xff]  ;;  %v414_v30 = vld [vmem:[%s3322_s1 + $0x110] sm:$0xff] }
 0x147   :  { %v2854_v40 = vadd.f32 %v130_v32, %v129_v24  ;;  %v2856_v41 = vadd.f32 %v144_v34, %v143_v26  ;;  %v915_v42 = vmul.f32 %v2850_v31, %v2850_v31  ;;  %v917_v43 = vmul.f32 %v2852_v0, %v2852_v0  ;;  %v412_v26 = vld [vmem:[%s3322_s1 + $0x100] sm:$0xff]  ;;  %v418_v32 = vld [vmem:[%s3322_s1 + $0x130] sm:$0xff] }
 0x148   :  { %v2862_v44 = vadd.f32 %v171_v35, %v170_v27  ;;  %v178_v45 = vrot.slane %v177_v36, 1  ;;  %v2864_v46 = vadd.f32 %v185_v38, %v184_v29  ;;  %v192_v47 = vrot.slane %v191_v39, 1  ;;  %v416_v27 = vld [vmem:[%s3322_s1 + $0x120] sm:$0xff]  ;;  %v571_v38 = vld [vmem:[%s3322_s1 + $0x168] sm:$0xff] }
 0x149   :  { %v732_v48 = vcombine.low %v2850_v31, %v2854_v40  ;;  %v733_v49 = vcombine.low %v2852_v0, %v2856_v41  ;;  %v916_v50 = vmul.f32 %v2854_v40, %v2854_v40  ;;  %v918_v51 = vmul.f32 %v2856_v41, %v2856_v41 }
 0x14a   :  { %v2874_v52 = vadd.f32 %v178_v45, %v177_v36  ;;  %v2876_v53 = vadd.f32 %v192_v47, %v191_v39  ;;  %v1015_v54 = vmul.f32 %v2862_v44, %v2862_v44  ;;  %v1017_v55 = vmul.f32 %v2864_v46, %v2864_v46  ;;  %v567_v36 = vld [vmem:[%s3322_s1 + $0x148] sm:$0xff]  ;;  %v569_v39 = vld [vmem:[%s3322_s1 + $0x158] sm:$0xff] }
 0x14b   :  { %v740_v56 = vrot.slane %v732_v48, %v2830_v37  ;;  %v747_v57 = vrot.slane %v733_v49, %v2830_v37  ;;  %v923_v58 = vcombine.low %v915_v42, %v916_v50  ;;  %v924_v59 = vcombine.low %v917_v43, %v918_v51  ;;  %v573_v43 = vld [vmem:[%s3322_s1 + $0x178] sm:$0xff]  ;;  %v566_v49 = vld [vmem:[%s3322_s1 + $0x140] sm:$0xff]  ;;  %v568_v51 = vld [vmem:[%s3322_s1 + $0x150] sm:$0xff] }
 0x14c   :  { %v827_v60 = vcombine.low %v2862_v44, %v2874_v52  ;;  %v828_v61 = vcombine.low %v2864_v46, %v2876_v53  ;;  %v1016_v62 = vmul.f32 %v2874_v52, %v2874_v52  ;;  %v1018_v63 = vmul.f32 %v2876_v53, %v2876_v53  ;;  %v570_v50 = vld [vmem:[%s3322_s1 + $0x160] sm:$0xff] }
 0x14d   :  { %v748_v3 = vcombine.low %v740_v56, %v747_v57  ;;  %v931_v4 = vrot.slane %v923_v58, %v2830_v37  ;;  %v938_v5 = vrot.slane %v924_v59, %v2830_v37  ;;  %v2352_v24 = vpack.c.bf16 %v417_v22, %v413_v21  ;;  %v572_v56 = vld [vmem:[%s3322_s1 + $0x170] sm:$0xff]  ;;  %v575_v57 = vld [vmem:[%s3322_s1 + $0x188] sm:$0xff] }
 0x14e   :  { %v835_v6 = vrot.slane %v827_v60, %v2830_v37  ;;  %v842_v7 = vrot.slane %v828_v61, %v2830_v37  ;;  %v1023_v8 = vcombine.low %v1015_v54, %v1016_v62  ;;  %v1024_v9 = vcombine.low %v1017_v55, %v1018_v63  ;;  %v579_v58 = vld [vmem:[%s3322_s1 + $0x1a8] sm:$0xff]  ;;  %v577_v61 = vld [vmem:[%s3322_s1 + $0x198] sm:$0xff] }
 0x14f   :  { %v755_v10 = vrot.slane %v748_v3, %v2830_v37  ;;  %v939_v11 = vcombine.low %v931_v4, %v938_v5  ;;  %v2360_v28 = vpack.c.bf16 %v419_v25, %v415_v23  ;;  %v2354_v29 = vpack.c.bf16 %v416_v27, %v412_v26  ;;  %2353 = vmatprep.subr.bf16.mxu0 %v2352_v24  ;;  %v581_v62 = vld [vmem:[%s3322_s1 + $0x1b8] sm:$0xff] }
 0x150   :  { %v843_v12 = vcombine.low %v835_v6, %v842_v7  ;;  %v1031_v16 = vrot.slane %v1023_v8, %v2830_v37  ;;  %v1038_v13 = vrot.slane %v1024_v9, %v2830_v37  ;;  %v2362_v34 = vpack.c.bf16 %v418_v32, %v414_v30  ;;  %v574_v6 = vld [vmem:[%s3322_s1 + $0x180] sm:$0xff]  ;;  %v576_v9 = vld [vmem:[%s3322_s1 + $0x190] sm:$0xff] }
 0x151   :  { %v946_v14 = vrot.slane %v939_v11, %v2830_v37  ;;  %761 = vst.msk [vmem:[#allocation2] ss:$8 sm:$0xf] %vm2893_vm1, %v755_v10  ;;  %2361 = vmatprep.subr.bf16.mxu1 %v2360_v28  ;;  %2355 = vmatpush1.bf16.msra.mxu0 %v2354_v29  ;;  %v2515_v35 = vmov 0.0   ;;  %v2364_v42 = vpack.c.bf16 %v571_v38, %v567_v36  ;;  %v578_v7 = vld [vmem:[%s3322_s1 + $0x1a0] sm:$0xff]  ;;  %v580_v10 = vld [vmem:[%s3322_s1 + $0x1b0] sm:$0xff] }
 0x152   :  { %v850_v15 = vrot.slane %v843_v12, %v2830_v37  ;;  %v1039_v17 = vcombine.low %v1031_v16, %v1038_v13  ;;  %2363 = vmatpush1.bf16.msra.mxu1 %v2362_v34  ;;  %488 = vmatprep.mubr.f32.mxu0 %v2515_v35  ;;  %v2372_v45 = vpack.c.bf16 %v573_v43, %v569_v39 }
 0x153   :  { %949 = vst.msk [vmem:[#allocation2 + $0x4] ss:$8 sm:$0xf] %vm2893_vm1, %v946_v14  ;;  %559 = vmatprep.mubr.f32.mxu1 %v2515_v35  ;;  %2365 = vmatprep.subr.bf16.mxu0 %v2364_v42  ;;  %v2366_v63 = vpack.c.bf16 %v570_v50, %v566_v49  ;;  %v2374_v4 = vpack.c.bf16 %v572_v56, %v568_v51 }
 0x154   :  { %v1046_v20 = vrot.slane %v1039_v17, %v2830_v37  ;;  %853 = vst.msk [vmem:[#allocation2 + $0x2] ss:$8 sm:$0xf] %vm2893_vm1, %v850_v15  ;;  %2373 = vmatprep.subr.bf16.mxu1 %v2372_v45  ;;  %v2368_v5 = vpack.c.bf16 %v579_v58, %v575_v57  ;;  %v2376_v8 = vpack.c.bf16 %v581_v62, %v577_v61 }
 0x155   :  { %v2370_v11 = vpack.c.bf16 %v578_v7, %v574_v6  ;;  %v2378_v12 = vpack.c.bf16 %v580_v10, %v576_v9 }
 0x156   :  { %1049 = vst.msk [vmem:[#allocation2 + $0x6] ss:$8 sm:$0xf] %vm2893_vm1, %v1046_v20 }
 0x20f   :  { %v2246_v47 = vpop.f32.mrb[0].mxu0  ;;  %v2281_v48 = vpop.f32.mrb[0].mxu1 }
 0x210   :  { %v2247_v54 = vpop.f32.mrb[1].mxu0  ;;  %v2282_v55 = vpop.f32.mrb[1].mxu1 }
 0x211   :  { %v2248_v59 = vadd.f32 %v2247_v54, %v2246_v47  ;;  %v2283_v60 = vadd.f32 %v2282_v55, %v2281_v48 }
 0x213   :  { %v401_v3 = vadd.f32 %v2283_v60, %v2248_v59 }
 0x215   :  { %582 = vrot.lane.b32.xlu0 %v401_v3, %s2516_s25  ;;  %2196 = vmatmul.mubr.msk.f32.vlgmr.msra.gmra.mrb[2].mxu0 %vm420_vm2, %v401_v3  ;;  %s2517_s25 = smov [#allocation4]  }
 0x216   :  { %2197 = vmatmul.mubr.msk.f32.vlgmr.msra.gmra.mrb[2].mxu1 %vm420_vm2, %v401_v3  ;;  %2367 = vmatpush1.bf16.msra.mxu0 %v2366_v63  ;;  %s2188_s26 = sshll.u32 %s2517_s25, 4  ;;  %s2189_s26 = int_to_ptr.vmem [resolvable:$true] %s2188_s26 }
 0x217   :  { %2375 = vmatpush1.bf16.msra.mxu1 %v2374_v4  ;;  %2369 = vmatprep.subr.bf16.mxu0 %v2368_v5  ;;  %p2493_p1 = scmp.lt.s32.totalorder %s2189_s26, %s2189_s26 }
 0x218   :  { %2377 = vmatprep.subr.bf16.mxu1 %v2376_v8  ;;  %650 = vmatprep.mubr.f32.mxu0 %v2515_v35 }
 0x219   :  { %721 = vmatprep.mubr.f32.mxu1 %v2515_v35 }
 0x21a   :  { %2371 = vmatpush1.bf16.msra.mxu0 %v2370_v11  ;;  %v1116_v11 = vld [vmem:[%s3322_s1 + $0x48] sm:$0xff] }
 0x21b   :  { %2379 = vmatpush1.bf16.msra.mxu1 %v2378_v12  ;;  %v1120_v12 = vld [vmem:[%s3322_s1 + $0x68] sm:$0xff] }
 0x287   :  { %v583_v16 = vpop.permute.xlu0 %582 }
 0x288   :  { %2198 = vmatmul.mubr.msk.f32.vlgmr.msra.gmra.mrb[4].mxu0 %vm420_vm2, %v583_v16  ;;  %2199 = vmatmul.mubr.msk.f32.vlgmr.msra.gmra.mrb[4].mxu1 %vm420_vm2, %v583_v16 }
 0x289   :  { %1356 = vmatprep.mubr.f32.mxu1 %v2515_v35 }
 0x2e8   :  { %v2996_v13 = vpop.f32.mrb[2].mxu0 }
 0x2e9   :  { %v763_v14 = vsel %vm34_vm0, %v2996_v13, 0.0  ;;  %v951_v15 = vmul.f32 %v2996_v13, %v2996_v13  ;;  %v3002_v17 = vpop.f32.mrb[2].mxu1  ;;  %v3004_v20 = vpop.f32.mrb[3].mxu0 }
 0x2ea   :  { %v764_v21 = vrot.slane %v763_v14, 4  ;;  %v777_v22 = vsel %vm34_vm0, %v3002_v17, 0.0  ;;  %v953_v23 = vmul.f32 %v3002_v17, %v3002_v17  ;;  %v770_v24 = vsel %vm34_vm0, %v3004_v20, 0.0  ;;  %v3012_v25 = vpop.f32.mrb[3].mxu1 }
 0x2eb   :  { %v955_v26 = vsel %vm34_vm0, %v951_v15, 0.0  ;;  %v778_v27 = vrot.slane %v777_v22, 4  ;;  %v771_v28 = vrot.slane %v770_v24, 4  ;;  %v952_v29 = vmul.f32 %v3004_v20, %v3004_v20 }
 0x2ec   :  { %v765_v30 = vadd.f32 %v764_v21, %v763_v14  ;;  %v956_v32 = vrot.slane %v955_v26, 4  ;;  %v969_v34 = vsel %vm34_vm0, %v953_v23, 0.0  ;;  %v784_v36 = vsel %vm34_vm0, %v3012_v25, 0.0  ;;  %v1119_v23 = vld [vmem:[%s3322_s1 + $0x60] sm:$0xff] }
 0x2ed   :  { %v779_v38 = vadd.f32 %v778_v27, %v777_v22  ;;  %v970_v39 = vrot.slane %v969_v34, 4  ;;  %v772_v42 = vadd.f32 %v771_v28, %v770_v24  ;;  %v962_v43 = vsel %vm34_vm0, %v952_v29, 0.0  ;;  %v1115_v22 = vld [vmem:[%s3322_s1 + $0x40] sm:$0xff] }
 0x2ee   :  { %v766_v45 = vrot.slane %v765_v30, 2  ;;  %v957_v47 = vadd.f32 %v956_v32, %v955_v26  ;;  %v963_v48 = vrot.slane %v962_v43, 4  ;;  %v785_v49 = vrot.slane %v784_v36, 4 }
 0x2ef   :  { %v780_v50 = vrot.slane %v779_v38, 2  ;;  %v971_v51 = vadd.f32 %v970_v39, %v969_v34  ;;  %v773_v54 = vrot.slane %v772_v42, 2  ;;  %v954_v55 = vmul.f32 %v3012_v25, %v3012_v25 }
 0x2f0   :  { %v767_v56 = vadd.f32 %v766_v45, %v765_v30  ;;  %v958_v57 = vrot.slane %v957_v47, 2  ;;  %v964_v58 = vadd.f32 %v963_v48, %v962_v43  ;;  %v786_v59 = vadd.f32 %v785_v49, %v784_v36  ;;  %v1128_v43 = vld [vmem:[%s3322_s1 + $0xa8] sm:$0xff]  ;;  %v1123_v49 = vld [vmem:[%s3322_s1 + $0x80] sm:$0xff] }
 0x2f1   :  { %v781_v60 = vadd.f32 %v780_v50, %v779_v38  ;;  %v972_v61 = vrot.slane %v971_v51, 2  ;;  %v774_v62 = vadd.f32 %v773_v54, %v772_v42  ;;  %v976_v63 = vsel %vm34_vm0, %v954_v55, 0.0  ;;  %v1124_v42 = vld [vmem:[%s3322_s1 + $0x88] sm:$0xff]  ;;  %v1127_v50 = vld [vmem:[%s3322_s1 + $0xa0] sm:$0xff] }
 0x2f2   :  { %v768_v3 = vrot.slane %v767_v56, 1  ;;  %v959_v4 = vadd.f32 %v958_v57, %v957_v47  ;;  %v965_v5 = vrot.slane %v964_v58, 2  ;;  %v787_v6 = vrot.slane %v786_v59, 2 }
 0x2f3   :  { %v782_v7 = vrot.slane %v781_v60, 1  ;;  %v973_v8 = vadd.f32 %v972_v61, %v971_v51  ;;  %v775_v9 = vrot.slane %v774_v62, 1  ;;  %v977_v10 = vrot.slane %v976_v63, 4 }
 0x2f4   :  { %v769_v16 = vadd.f32 %v768_v3, %v767_v56  ;;  %v960_v14 = vrot.slane %v959_v4, 1  ;;  %v966_v15 = vadd.f32 %v965_v5, %v964_v58  ;;  %v788_v21 = vadd.f32 %v787_v6, %v786_v59  ;;  %v1122_v5 = vld [vmem:[%s3322_s1 + $0x78] sm:$0xff] }
 0x2f5   :  { %v783_v24 = vadd.f32 %v782_v7, %v781_v60  ;;  %v776_v26 = vadd.f32 %v775_v9, %v774_v62  ;;  %v978_v27 = vadd.f32 %v977_v10, %v976_v63  ;;  %v3036_v32 = vpack.c.bf16 %v1120_v12, %v1116_v11 }
 0x2f6   :  { %v961_v28 = vadd.f32 %v960_v14, %v959_v4  ;;  %v967_v29 = vrot.slane %v966_v15, 1  ;;  %v789_v30 = vrot.slane %v788_v21, 1  ;;  %v974_v34 = vrot.slane %v973_v8, 1  ;;  %v1118_v4 = vld [vmem:[%s3322_s1 + $0x58] sm:$0xff] }
 0x2f7   :  { %v795_v36 = vcombine.low %v769_v16, %v776_v26  ;;  %v979_v38 = vrot.slane %v978_v27, 2  ;;  %v3038_v39 = vpack.c.bf16 %v1119_v23, %v1115_v22  ;;  %2381 = vmatprep.subr.bf16.mxu0 %v3036_v32  ;;  %v3047_v48 = vpack.c.bf16 %v1128_v43, %v1124_v42  ;;  %2397 = vmatprep.subr.bf16.mxu1 %v3036_v32 }
 0x2f8   :  { %v968_v45 = vadd.f32 %v967_v29, %v966_v15  ;;  %v790_v47 = vadd.f32 %v789_v30, %v788_v21  ;;  %v975_v57 = vadd.f32 %v974_v34, %v973_v8  ;;  %v3061_v59 = vpack.c.bf16 %v1127_v50, %v1123_v49 }
 0x2f9   :  { %v980_v51 = vadd.f32 %v979_v38, %v978_v27  ;;  %2383 = vmatpush1.bf16.xpose.msra.mxu0 %v3038_v39  ;;  %2399 = vmatpush1.bf16.msra.mxu1 %v3038_v39  ;;  %v803_v54 = vrot.slane %v795_v36, %v2830_v37  ;;  %v3073_v7 = vpack.c.bf16 %v1122_v5, %v1118_v4 }
 0x2fa   :  { %v987_v55 = vcombine.low %v961_v28, %v968_v45  ;;  %v796_v56 = vcombine.low %v783_v24, %v790_v47  ;;  %2385 = vmatprep.subr.bf16.mxu0 %v3047_v48  ;;  %2401 = vmatprep.subr.bf16.mxu1 %v3047_v48 }
 0x2fb   :  { %v981_v58 = vrot.slane %v980_v51, 1 }
 0x2fc   :  { %v810_v60 = vrot.slane %v796_v56, %v2830_v37  ;;  %v995_v63 = vrot.slane %v987_v55, %v2830_v37 }
 0x2fd   :  { %v982_v61 = vadd.f32 %v981_v58, %v980_v51  ;;  %2403 = vmatpush1.bf16.msra.mxu1 %v3061_v59 }
 0x2fe   :  { %v811_v62 = vcombine.low %v803_v54, %v810_v60  ;;  %2405 = vmatprep.subr.bf16.mxu1 %v3073_v7 }
 0x2ff   :  { %v988_v3 = vcombine.low %v975_v57, %v982_v61 }
 0x300   :  { %v818_v6 = vrot.slane %v811_v62, %v2830_v37 }
 0x301   :  { %v1002_v8 = vrot.slane %v988_v3, %v2830_v37  ;;  %2387 = vmatpush1.bf16.xpose.msra.mxu0 %v3061_v59 }
 0x302   :  { %821 = vst.msk [vmem:[#allocation2 + $0x1] ss:$8 sm:$0xf] %vm2893_vm1, %v818_v6  ;;  %2389 = vmatprep.subr.bf16.mxu0 %v3073_v7 }
 0x303   :  { %v1003_v9 = vcombine.low %v995_v63, %v1002_v8 }
 0x305   :  { %v1010_v10 = vrot.slane %v1003_v9, %v2830_v37 }
 0x307   :  { %1013 = vst.msk [vmem:[#allocation2 + $0x5] ss:$8 sm:$0xf] %vm2893_vm1, %v1010_v10 }
 0x35b   :  { %v3084_v11 = vpop.f32.mrb[4].mxu0  ;;  %v3086_v12 = vpop.f32.mrb[4].mxu1 }
 0x35c   :  { %v855_v16 = vsel %vm34_vm0, %v3084_v11, 0.0  ;;  %v1051_v14 = vmul.f32 %v3084_v11, %v3084_v11  ;;  %v869_v15 = vsel %vm34_vm0, %v3086_v12, 0.0  ;;  %v1053_v21 = vmul.f32 %v3086_v12, %v3086_v12  ;;  %v3096_v22 = vpop.f32.mrb[5].mxu0  ;;  %v3098_v23 = vpop.f32.mrb[5].mxu1 }
 0x35d   :  { %v856_v24 = vrot.slane %v855_v16, 4  ;;  %v870_v26 = vrot.slane %v869_v15, 4  ;;  %v862_v27 = vsel %vm34_vm0, %v3096_v22, 0.0  ;;  %v1052_v28 = vmul.f32 %v3096_v22, %v3096_v22 }
 0x35e   :  { %v1055_v29 = vsel %vm34_vm0, %v1051_v14, 0.0  ;;  %v1069_v30 = vsel %vm34_vm0, %v1053_v21, 0.0  ;;  %v863_v34 = vrot.slane %v862_v27, 4  ;;  %v876_v36 = vsel %vm34_vm0, %v3098_v23, 0.0 }
 0x35f   :  { %v857_v38 = vadd.f32 %v856_v24, %v855_v16  ;;  %v1056_v42 = vrot.slane %v1055_v29, 4  ;;  %v871_v43 = vadd.f32 %v870_v26, %v869_v15  ;;  %v1070_v45 = vrot.slane %v1069_v30, 4 }
 0x360   :  { %v864_v47 = vadd.f32 %v863_v34, %v862_v27  ;;  %v1062_v49 = vsel %vm34_vm0, %v1052_v28, 0.0  ;;  %v877_v50 = vrot.slane %v876_v36, 4  ;;  %v1054_v51 = vmul.f32 %v3098_v23, %v3098_v23 }
 0x361   :  { %v858_v54 = vrot.slane %v857_v38, 2  ;;  %v1057_v55 = vadd.f32 %v1056_v42, %v1055_v29  ;;  %v872_v56 = vrot.slane %v871_v43, 2  ;;  %v1071_v57 = vadd.f32 %v1070_v45, %v1069_v30 }
 0x362   :  { %v865_v58 = vrot.slane %v864_v47, 2  ;;  %v1063_v60 = vrot.slane %v1062_v49, 4  ;;  %v878_v61 = vadd.f32 %v877_v50, %v876_v36  ;;  %v1076_v62 = vsel %vm34_vm0, %v1054_v51, 0.0 }
 0x363   :  { %v859_v63 = vadd.f32 %v858_v54, %v857_v38  ;;  %v1058_v3 = vrot.slane %v1057_v55, 2  ;;  %v873_v4 = vadd.f32 %v872_v56, %v871_v43  ;;  %v1072_v5 = vrot.slane %v1071_v57, 2 }
 0x364   :  { %v866_v6 = vadd.f32 %v865_v58, %v864_v47  ;;  %v1064_v8 = vadd.f32 %v1063_v60, %v1062_v49  ;;  %v879_v9 = vrot.slane %v878_v61, 2  ;;  %v1077_v10 = vrot.slane %v1076_v62, 4 }
 0x365   :  { %v860_v16 = vrot.slane %v859_v63, 1  ;;  %v1059_v14 = vadd.f32 %v1058_v3, %v1057_v55  ;;  %v874_v15 = vrot.slane %v873_v4, 1  ;;  %v1073_v21 = vadd.f32 %v1072_v5, %v1071_v57 }
 0x366   :  { %v867_v24 = vrot.slane %v866_v6, 1  ;;  %v1065_v26 = vrot.slane %v1064_v8, 2  ;;  %v880_v27 = vadd.f32 %v879_v9, %v878_v61  ;;  %v1078_v28 = vadd.f32 %v1077_v10, %v1076_v62 }
 0x367   :  { %v861_v29 = vadd.f32 %v860_v16, %v859_v63  ;;  %v1060_v30 = vrot.slane %v1059_v14, 1  ;;  %v875_v34 = vadd.f32 %v874_v15, %v873_v4  ;;  %v1074_v36 = vrot.slane %v1073_v21, 1  ;;  %v1117_v16 = vld [vmem:[%s3322_s1 + $0x50] sm:$0xff]  ;;  %v1126_v15 = vld [vmem:[%s3322_s1 + $0x98] sm:$0xff] }
 0x368   :  { %v868_v38 = vadd.f32 %v867_v24, %v866_v6  ;;  %v1066_v42 = vadd.f32 %v1065_v26, %v1064_v8  ;;  %v881_v43 = vrot.slane %v880_v27, 1  ;;  %v1079_v45 = vrot.slane %v1078_v28, 2 }
 0x369   :  { %v1061_v47 = vadd.f32 %v1060_v30, %v1059_v14  ;;  %v1075_v55 = vadd.f32 %v1074_v36, %v1073_v21  ;;  %v1121_v14 = vld [vmem:[%s3322_s1 + $0x70] sm:$0xff]  ;;  %v1130_v21 = vld [vmem:[%s3322_s1 + $0xb8] sm:$0xff]  ;;  %v1275_v36 = vld [vmem:[%s3325_s4] sm:$0xff] }
 0x36a   :  { %v887_v49 = vcombine.low %v861_v29, %v868_v38  ;;  %v1067_v50 = vrot.slane %v1066_v42, 1  ;;  %v882_v51 = vadd.f32 %v881_v43, %v880_v27  ;;  %v1080_v54 = vadd.f32 %v1079_v45, %v1078_v28  ;;  %v1125_v28 = vld [vmem:[%s3322_s1 + $0x90] sm:$0xff] }
 0x36b   :  { %v2392_v26 = vpack.c.bf16 %v1130_v21, %v1126_v15  ;;  %v1129_v29 = vld [vmem:[%s3322_s1 + $0xb0] sm:$0xff]  ;;  %v3220_v15 = vsub.s32 2, %v2792_v18 }
 0x36c   :  { %v895_v56 = vrot.slane %v887_v49, %v2830_v37  ;;  %v1068_v57 = vadd.f32 %v1067_v50, %v1066_v42  ;;  %v888_v58 = vcombine.low %v875_v34, %v882_v51  ;;  %v1081_v60 = vrot.slane %v1080_v54, 1 }
 0x36d   :  { %v2394_v30 = vpack.c.bf16 %v1129_v29, %v1125_v28 }
 0x36e   :  { %v1087_v61 = vcombine.low %v1061_v47, %v1068_v57  ;;  %v902_v62 = vrot.slane %v888_v58, %v2830_v37  ;;  %v1082_v63 = vadd.f32 %v1081_v60, %v1080_v54  ;;  %v1282_v54 = vld [vmem:[%s3325_s4 + $0x8] sm:$0xf] }
 0x370   :  { %v1095_v3 = vrot.slane %v1087_v61, %v2830_v37  ;;  %v903_v4 = vcombine.low %v895_v56, %v902_v62  ;;  %v1088_v5 = vcombine.low %v1075_v55, %v1082_v63 }
 0x372   :  { %v910_v6 = vrot.slane %v903_v4, %v2830_v37  ;;  %v1102_v8 = vrot.slane %v1088_v5, %v2830_v37 }
 0x374   :  { %913 = vst.msk [vmem:[#allocation2 + $0x3] ss:$8 sm:$0xf] %vm2893_vm1, %v910_v6  ;;  %v1103_v9 = vcombine.low %v1095_v3, %v1102_v8 }
 0x376   :  { %v1110_v10 = vrot.slane %v1103_v9, %v2830_v37  ;;  %v2390_v37 = vpack.c.bf16 %v1121_v14, %v1117_v16  ;;  %v1580_v16 = vld [vmem:[%s3322_s1 + $0x28] sm:$0xf]  ;;  %v3217_v14 = vsub.s32 0, %v2792_v18 }
 0x378   :  { %1113 = vst.msk [vmem:[#allocation2 + $0x7] ss:$8 sm:$0xf] %vm2893_vm1, %v1110_v10  ;;  %v1579_v10 = vld [vmem:[%s3322_s1 + $0x20] sm:$0xf] }
 0x37f   :  { %v1132_v24 = vld [vmem:[#allocation2 + $0x8] sm:$0xff]  ;;  %v1131_v2 = vld [vmem:[#allocation2] sm:$0xff]  ;;  %v1134_v27 = vld [vmem:[#allocation2 + $0x18] sm:$0xff] }
 0x380   :  { %1199 = vmatprep.mubr.f32.mxu0 %v1132_v24  ;;  %v1133_v34 = vld [vmem:[#allocation2 + $0x10] sm:$0xff] }
 0x381   :  { %1200 = vmatmul.mubr.f32.vlgmr.msra.gmra.mrb[6].mxu0 %v1131_v2 }
 0x382   :  { %2391 = vmatpush1.bf16.xpose.msra.mxu0 %v2390_v37  ;;  %1269 = vmatprep.mubr.f32.mxu0 %v1134_v27 }
 0x383   :  { %2393 = vmatprep.subr.bf16.mxu0 %v2392_v26 }
 0x38a   :  { %2395 = vmatpush1.bf16.xpose.msra.mxu0 %v2394_v30 }
 0x391   :  { %1270 = vmatmul.mubr.f32.vlgmr.msra.gmra.mrb[6].mxu0 %v1133_v34 }
 0x392   :  { %1932 = vmatprep.mubr.f32.mxu0 %v2515_v35 }
 0x464   :  { %v1271_v38 = vpop.f32.mrb[6].mxu0 }
 0x465   :  { %v1276_v42 = vmul.f32 %v1275_v36, %v1271_v38  ;;  %v1273_v43 = vpop.f32.mrb[7].mxu0 }
 0x467   :  { %v1277_v45 = vmul.f32 %v1276_v42, %v1276_v42  ;;  %2200 = vmatmul.mubr.msk.f32.vlgmr.msra.gmra.mrb[6].mxu1 %vm420_vm2, %v1276_v42 }
 0x468   :  { %2407 = vmatpush1.bf16.msra.mxu1 %v2390_v37  ;;  %1427 = vmatprep.mubr.f32.mxu1 %v2515_v35 }
 0x469   :  { %v1279_v47 = vrot.slane %v1277_v45, 4  ;;  %2409 = vmatprep.subr.bf16.mxu1 %v2392_v26 }
 0x46b   :  { %v1281_v49 = vsub.f32 %v1276_v42, %v1279_v47 }
 0x46c   :  { %2411 = vmatpush1.bf16.msra.mxu1 %v2394_v30 }
 0x46d   :  { %v1283_v50 = vadd.f32 1e-05, %v1281_v49  ;;  %2413 = vmatprep.subr.bf16.mxu1 %v3036_v32 }
 0x46f   :  { %2446 = vrsqrt.f32 %v1283_v50  ;;  %2201 = vmatmul.mubr.msk.f32.vlgmr.msra.gmra.mrb[8].mxu1 %vm420_vm2, %v1276_v42 }
 0x470   :  { %2415 = vmatpush1.bf16.msra.mxu1 %v3038_v39  ;;  %1501 = vmatprep.mubr.f32.mxu1 %v2515_v35  ;;  %v3161_v39 = vsub.s32 1, %v2792_v18 }
 0x471   :  { %2417 = vmatprep.subr.bf16.mxu1 %v3047_v48  ;;  %v3164_v48 = vsub.s32 3, %v2792_v18 }
 0x472   :  { %v1642_v21 = vrot.slane %v1580_v16, %v3161_v39 }
 0x474   :  { %2419 = vmatpush1.bf16.msra.mxu1 %v3061_v59 }
 0x475   :  { %2421 = vmatprep.subr.bf16.mxu1 %v3073_v7 }
 0x479   :  { %v2447_v51 = vpop.eup %2446 }
 0x47a   :  { %v1286_v55 = vrot.slane %v2447_v51, 4 }
 0x47c   :  { %v1288_v32 = vmul.f32 %v1286_v55, %v1282_v54 }
 0x47e   :  { %2202 = vmatmul.mubr.msk.f32.vlgmr.msra.gmra.mrb[10].mxu1 %vm420_vm2, %v1288_v32 }
 0x47f   :  { %2423 = vmatpush1.bf16.msra.mxu1 %v2390_v37  ;;  %1572 = vmatprep.mubr.f32.mxu1 %v2515_v35  ;;  %v1714_v37 = vrot.slane %v1580_v16, %v3164_v48 }
 0x480   :  { %2425 = vmatprep.subr.bf16.mxu1 %v2392_v26 }
 0x483   :  { %2427 = vmatpush1.bf16.msra.mxu1 %v2394_v30 }
 0x486   :  { %2203 = vmatmul.mubr.msk.f32.vlgmr.msra.gmra.mrb[12].mxu1 %vm420_vm2, %v1288_v32 }
 0x487   :  { %2003 = vmatprep.mubr.f32.mxu1 %v2515_v35 }
 0x53a   :  { %v1358_v59 = vpop.f32.mrb[6].mxu1 }
 0x53b   :  { %v1598_v7 = vrot.slane %v1358_v59, %v3161_v39  ;;  %v1670_v56 = vrot.slane %v1358_v59, %v3164_v48  ;;  %v1360_v57 = vpop.f32.mrb[7].mxu1  ;;  %v1583_v24 = vsub.f32 %v2850_v31, %v1358_v59  ;;  %v1655_v2 = vsub.f32 %v2862_v44, %v1358_v59 }
 0x53c   :  { %v1602_v58 = vrot.slane %v1360_v57, %v3161_v39  ;;  %v1674_v60 = vrot.slane %v1360_v57, %v3164_v48  ;;  %v1584_v28 = vsub.f32 %v2854_v40, %v1360_v57  ;;  %v1656_v29 = vsub.f32 %v2874_v52, %v1360_v57 }
 0x53d   :  { %v1611_v61 = vsub.f32 %v2996_v13, %v1598_v7  ;;  %v1683_v35 = vsub.f32 %v3084_v11, %v1670_v56 }
 0x53e   :  { %v1612_v62 = vsub.f32 %v3004_v20, %v1602_v58  ;;  %v1684_v63 = vsub.f32 %v3096_v22, %v1674_v60 }
 0x542   :  { %v3174_v3 = vpop.f32.mrb[8].mxu1 }
 0x543   :  { %v1606_v4 = vrot.slane %v3174_v3, %v3161_v39  ;;  %v1678_v5 = vrot.slane %v3174_v3, %v3164_v48  ;;  %v3180_v6 = vpop.f32.mrb[9].mxu1 }
 0x544   :  { %v1610_v8 = vrot.slane %v3180_v6, %v3161_v39  ;;  %v1682_v13 = vrot.slane %v3180_v6, %v3164_v48 }
 0x545   :  { %v3187_v20 = vsub.f32 %v3002_v17, %v1606_v4  ;;  %v3190_v11 = vsub.f32 %v3086_v12, %v1678_v5  ;;  %v3207_v17 = vld [vmem:[%s3322_s1 + $0x30] sm:$0xf]  ;;  %v1638_v12 = vrot.slane %v1579_v10, %v3161_v39 }
 0x546   :  { %v3193_v22 = vsub.f32 %v3012_v25, %v1610_v8  ;;  %v3196_v9 = vsub.f32 %v3098_v23, %v1682_v13  ;;  %v1710_v25 = vrot.slane %v1579_v10, %v3164_v48  ;;  %v3214_v23 = vld [vmem:[%s3322_s1 + $0x38] sm:$0xf]  ;;  %v1646_v26 = vrot.slane %v3207_v17, %v3161_v39 }
 0x547   :  { %v1718_v27 = vrot.slane %v3207_v17, %v3164_v48  ;;  %v1650_v30 = vrot.slane %v3214_v23, %v3161_v39  ;;  %v1722_v34 = vrot.slane %v3214_v23, %v3164_v48  ;;  %v1586_v13 = vsub.f32 %v2856_v41, %v3180_v6 }
 0x551   :  { %v1503_v18 = vpop.f32.mrb[10].mxu1 }
 0x552   :  { %v1587_v31 = vmul.f32 %v1583_v24, %v1503_v18  ;;  %v1618_v44 = vrot.slane %v1503_v18, %v3161_v39  ;;  %v1659_v36 = vmul.f32 %v1655_v2, %v1503_v18  ;;  %v1690_v38 = vrot.slane %v1503_v18, %v3164_v48  ;;  %v1505_v42 = vpop.f32.mrb[11].mxu1 }
 0x553   :  { %v1588_v43 = vmul.f32 %v1584_v28, %v1505_v42  ;;  %v1622_v45 = vrot.slane %v1505_v42, %v3161_v39  ;;  %v1660_v40 = vmul.f32 %v1656_v29, %v1505_v42  ;;  %v1694_v52 = vrot.slane %v1505_v42, %v3164_v48 }
 0x554   :  { %v1591_v47 = vadd.f32 %v1587_v31, %v1579_v10  ;;  %v1631_v49 = vmul.f32 %v1618_v44, %v1611_v61  ;;  %v1663_v50 = vadd.f32 %v1659_v36, %v1579_v10  ;;  %v1703_v51 = vmul.f32 %v1690_v38, %v1683_v35 }
 0x555   :  { %v1592_v54 = vadd.f32 %v1588_v43, %v1580_v16  ;;  %v1632_v55 = vmul.f32 %v1622_v45, %v1612_v62  ;;  %v1664_v32 = vadd.f32 %v1660_v40, %v1580_v16  ;;  %v1704_v59 = vmul.f32 %v1694_v52, %v1684_v63 }
 0x556   :  { %v1651_v7 = vadd.f32 %v1638_v12, %v1631_v49  ;;  %v1723_v56 = vadd.f32 %v1710_v25, %v1703_v51  ;;  %v1730_v57 = vrot.slane %v1591_v47, %v3217_v14  ;;  %v1754_v58 = vrot.slane %v1663_v50, %v3220_v15 }
 0x557   :  { %v1652_v60 = vadd.f32 %v1642_v21, %v1632_v55  ;;  %v1724_v4 = vadd.f32 %v1714_v37, %v1704_v59  ;;  %v1734_v5 = vrot.slane %v1592_v54, %v3217_v14  ;;  %v1758_v8 = vrot.slane %v1664_v32, %v3220_v15 }
 0x558   :  { %v1585_v61 = vsub.f32 %v2852_v0, %v3174_v3  ;;  %v1657_v35 = vsub.f32 %v2864_v46, %v3174_v3  ;;  %v1743_v62 = vmul.f32 %v1730_v57, %v1651_v7  ;;  %v1767_v63 = vmul.f32 %v1754_v58, %v1723_v56 }
 0x559   :  { %v1658_v10 = vsub.f32 %v2876_v53, %v3180_v6  ;;  %v1744_v16 = vmul.f32 %v1734_v5, %v1652_v60  ;;  %v1768_v12 = vmul.f32 %v1758_v8, %v1724_v4  ;;  %v1574_v25 = vpop.f32.mrb[12].mxu1 }
 0x55a   :  { %1747 = vst [vmem:[#allocation3] sm:$0xf] %v1743_v62  ;;  %v1775_v21 = vrot.slane %v1767_v63, 4  ;;  %v1589_v37 = vmul.f32 %v1585_v61, %v1574_v25  ;;  %v1626_v24 = vrot.slane %v1574_v25, %v3161_v39  ;;  %v1661_v0 = vmul.f32 %v1657_v35, %v1574_v25  ;;  %v1576_v2 = vpop.f32.mrb[13].mxu1  ;;  %v1791_v62 = vld [vmem:[%s3324_s3 + $0x8] sm:$0xff] }
 0x55b   :  { %1748 = vst [vmem:[#allocation3 + $0x8] sm:$0xf] %v1744_v16  ;;  %v1776_v46 = vrot.slane %v1768_v12, 4  ;;  %v1698_v3 = vrot.slane %v1574_v25, %v3164_v48  ;;  %v1590_v28 = vmul.f32 %v1586_v13, %v1576_v2  ;;  %v1630_v41 = vrot.slane %v1576_v2, %v3161_v39 }
 0x55c   :  { %1783 = vst [vmem:[#allocation3] sm:$0xf0] %v1775_v21  ;;  %v1593_v53 = vadd.f32 %v1589_v37, %v3207_v17  ;;  %v1633_v6 = vmul.f32 %v1626_v24, %v3187_v20  ;;  %v1665_v29 = vadd.f32 %v1661_v0, %v3207_v17  ;;  %v1662_v18 = vmul.f32 %v1658_v10, %v1576_v2  ;;  %v1792_v10 = vld [vmem:[%s3324_s3 + $0x10] sm:$0xff] }
 0x55d   :  { %1784 = vst [vmem:[#allocation3 + $0x8] sm:$0xf0] %v1776_v46  ;;  %v1705_v31 = vmul.f32 %v1698_v3, %v3190_v11  ;;  %v1594_v44 = vadd.f32 %v1590_v28, %v3214_v23  ;;  %v1634_v36 = vmul.f32 %v1630_v41, %v3193_v22  ;;  %v1702_v38 = vrot.slane %v1576_v2, %v3164_v48 }
 0x55e   :  { %v1653_v42 = vadd.f32 %v1646_v26, %v1633_v6  ;;  %v1738_v39 = vrot.slane %v1593_v53, %v3217_v14  ;;  %v1762_v43 = vrot.slane %v1665_v29, %v3220_v15  ;;  %v1666_v45 = vadd.f32 %v1662_v18, %v3214_v23 }
 0x55f   :  { %v1725_v20 = vadd.f32 %v1718_v27, %v1705_v31  ;;  %v1654_v40 = vadd.f32 %v1650_v30, %v1634_v36  ;;  %v1706_v11 = vmul.f32 %v1702_v38, %v3196_v9  ;;  %v1742_v52 = vrot.slane %v1594_v44, %v3217_v14 }
 0x560   :  { %v1745_v47 = vmul.f32 %v1738_v39, %v1653_v42  ;;  %v1766_v22 = vrot.slane %v1666_v45, %v3220_v15 }
 0x561   :  { %v1769_v49 = vmul.f32 %v1762_v43, %v1725_v20  ;;  %v1726_v26 = vadd.f32 %v1722_v34, %v1706_v11  ;;  %v1746_v50 = vmul.f32 %v1742_v52, %v1654_v40 }
 0x562   :  { %1749 = vst [vmem:[#allocation3 + $0x10] sm:$0xf] %v1745_v47 }
 0x563   :  { %v1777_v51 = vrot.slane %v1769_v49, 4  ;;  %1750 = vst [vmem:[#allocation3 + $0x18] sm:$0xf] %v1746_v50  ;;  %v1770_v54 = vmul.f32 %v1766_v22, %v1726_v26  ;;  %v1787_v27 = vld [vmem:[#allocation3] sm:$0xff] }
 0x564   :  { %v1788_v30 = vld [vmem:[#allocation3 + $0x8] sm:$0xff]  ;;  %v1799_v9 = vmul.f32 %v1787_v27, %v1787_v27 }
 0x565   :  { %1785 = vst [vmem:[#allocation3 + $0x10] sm:$0xf0] %v1777_v51  ;;  %v1778_v17 = vrot.slane %v1770_v54, 4  ;;  %v1800_v14 = vmul.f32 %v1788_v30, %v1788_v30  ;;  %v1793_v55 = vadd.f32 %v1788_v30, %v1787_v27 }
 0x567   :  { %1786 = vst [vmem:[#allocation3 + $0x18] sm:$0xf0] %v1778_v17  ;;  %v1803_v7 = vadd.f32 %v1800_v14, %v1799_v9  ;;  %v1863_v14 = vld [vmem:[%s3326_s5] sm:$0xf] }
 0x56c   :  { %v1789_v32 = vld [vmem:[#allocation3 + $0x10] sm:$0xff] }
 0x56d   :  { %v1794_v15 = vadd.f32 %v1793_v55, %v1789_v32  ;;  %v1801_v59 = vmul.f32 %v1789_v32, %v1789_v32 }
 0x56e   :  { %v1790_v56 = vld [vmem:[#allocation3 + $0x18] sm:$0xff] }
 0x56f   :  { %v1795_v48 = vadd.f32 %v1794_v15, %v1790_v56  ;;  %v1802_v23 = vmul.f32 %v1790_v56, %v1790_v56  ;;  %v1804_v34 = vadd.f32 %v1803_v7, %v1801_v59 }
 0x571   :  { %1796 = vadd.xlane.f32.xlu1 %v1795_v48  ;;  %v1805_v57 = vadd.f32 %v1804_v34, %v1802_v23 }
 0x573   :  { %1806 = vadd.xlane.f32.xlu0 %v1805_v57 }
 0x5fe   :  { %v1797_v58 = vpop.xlane.xlu1 %1796 }
 0x5ff   :  { %v1798_v60 = vmul.f32 0.001953125, %v1797_v58 }
 0x600   :  { %v1807_v4 = vpop.xlane.xlu0 %1806 }
 0x601   :  { %v1809_v5 = vmul.f32 %v1798_v60, %v1798_v60  ;;  %v1808_v8 = vmul.f32 0.001953125, %v1807_v4 }
 0x603   :  { %v1810_v61 = vsub.f32 %v1808_v8, %v1809_v5 }
 0x605   :  { %v1811_v35 = vadd.f32 1e-05, %v1810_v61 }
 0x607   :  { %2448 = vrsqrt.f32 %v1811_v35 }
 0x611   :  { %v2449_v63 = vpop.eup %2448 }
 0x612   :  { %v1813_v13 = vmul.f32 %v2449_v63, %v1791_v62 }
 0x614   :  { %1816 = vperm.xlu1 %2436, %v1813_v13   ;;  %v1823_v16 = vmul.f32 %v1813_v13, %v1798_v60 }
 0x616   :  { %v1824_v12 = vsub.f32 %v1792_v10, %v1823_v16 }
 0x618   :  { %1827 = vperm.xlu0 %2437, %v1824_v12  }
 0x693   :  { %v1817_v25 = vpop.permute.xlu1 %1816 }
 0x694   :  { %v1819_v21 = vmul.f32 %v1817_v25, %v1787_v27  ;;  %v1820_v37 = vmul.f32 %v1817_v25, %v1788_v30  ;;  %v1821_v24 = vmul.f32 %v1817_v25, %v1789_v32  ;;  %v1822_v28 = vmul.f32 %v1817_v25, %v1790_v56 }
 0x697   :  { %v1828_v0 = vpop.permute.xlu0 %1827 }
 0x698   :  { %v1830_v2 = vadd.f32 %v1828_v0, %v1819_v21  ;;  %v1831_v46 = vadd.f32 %v1828_v0, %v1820_v37  ;;  %v1832_v3 = vadd.f32 %v1828_v0, %v1821_v24  ;;  %v1833_v29 = vadd.f32 %v1828_v0, %v1822_v28 }
 0x69a   :  { %v1834_v41 = vadd.f32 %v1831_v46, %v1830_v2  ;;  %v1840_v53 = vmul.f32 %v1830_v2, %v1830_v2  ;;  %v1841_v6 = vmul.f32 %v1831_v46, %v1831_v46  ;;  %v1842_v31 = vmul.f32 %v1832_v3, %v1832_v3 }
 0x69b   :  { %v1843_v42 = vmul.f32 %v1833_v29, %v1833_v29 }
 0x69c   :  { %v1835_v18 = vadd.f32 %v1834_v41, %v1832_v3  ;;  %v1844_v44 = vadd.f32 %v1841_v6, %v1840_v53 }
 0x69e   :  { %v1836_v36 = vadd.f32 %v1835_v18, %v1833_v29  ;;  %v1845_v38 = vadd.f32 %v1844_v44, %v1842_v31 }
 0x6a0   :  { %1837 = vadd.xlane.f32.xlu1 %v1836_v36  ;;  %v1846_v39 = vadd.f32 %v1845_v38, %v1843_v42 }
 0x6a4   :  { %1847 = vadd.xlane.f32.xlu1 %v1846_v39 }
 0x72d   :  { %v1838_v43 = vpop.xlane.xlu1 %1837 }
 0x72e   :  { %v1839_v45 = vmul.f32 0.001953125, %v1838_v43 }
 0x730   :  { %v1850_v40 = vmul.f32 %v1839_v45, %v1839_v45 }
 0x731   :  { %v1848_v20 = vpop.xlane.xlu1 %1847 }
 0x732   :  { %v1849_v11 = vmul.f32 0.001953125, %v1848_v20 }
 0x734   :  { %v1851_v52 = vsub.f32 %v1849_v11, %v1850_v40 }
 0x736   :  { %v1852_v47 = vadd.f32 1e-05, %v1851_v52 }
 0x738   :  { %2450 = vrsqrt.f32 %v1852_v47 }
 0x742   :  { %v2451_v22 = vpop.eup %2450 }
 0x743   :  { %v1855_v49 = vmul.f32 %v2451_v22, %v1831_v46  ;;  %v1858_v26 = vmul.f32 %v2451_v22, %v1839_v45  ;;  %v1857_v50 = vmul.f32 %v2451_v22, %v1833_v29  ;;  %v1854_v51 = vmul.f32 %v2451_v22, %v1830_v2 }
 0x744   :  { %v1856_v54 = vmul.f32 %v2451_v22, %v1832_v3 }
 0x745   :  { %v1860_v17 = vsub.f32 %v1855_v49, %v1858_v26  ;;  %v1862_v27 = vsub.f32 %v1857_v50, %v1858_v26  ;;  %v1859_v30 = vsub.f32 %v1854_v51, %v1858_v26 }
 0x746   :  { %v1861_v9 = vsub.f32 %v1856_v54, %v1858_v26 }
 0x747   :  { %1868 = vmatprep.subr.mxu0 %v1860_v17  ;;  %1939 = vmatprep.subr.mxu1 %v1862_v27 }
 0x748   :  { %1869 = vmatpush1.msra.mxu0 %v1859_v30  ;;  %1940 = vmatpush1.msra.mxu1 %v1861_v9 }
 0x749   :  { %2204 = vmatmul.mubr.msk.f32.vlgmr.msra.gmra.mrb[8].mxu0 %vm1864_vm3, %v1863_v14  ;;  %2205 = vmatmul.mubr.msk.f32.vlgmr.msra.gmra.mrb[14].mxu1 %vm1864_vm3, %v1863_v14 }
 0x81c   :  { %v1934_v55 = vpop.f32.mrb[8].mxu0  ;;  %v2005_v32 = vpop.f32.mrb[14].mxu1 }
 0x81d   :  { %v2010_v15 = vsel %vm34_vm0, %v1934_v55, 0.0  ;;  %v2020_v59 = vmul.f32 %v1934_v55, %v1934_v55  ;;  %v1936_v7 = vpop.f32.mrb[9].mxu0  ;;  %v2022_v56 = vmul.f32 %v2005_v32, %v2005_v32  ;;  %v2007_v48 = vpop.f32.mrb[15].mxu1  ;;  %v2013_v57 = vsel %vm34_vm0, %v2005_v32, 0.0 }
 0x81e   :  { %v2011_v23 = vsel %vm34_vm0, %v1936_v7, 0.0  ;;  %v2021_v34 = vmul.f32 %v1936_v7, %v1936_v7  ;;  %v2023_v5 = vmul.f32 %v2007_v48, %v2007_v48  ;;  %v2015_v62 = vsel %vm34_vm0, %v2007_v48, 0.0 }
 0x81f   :  { %v2024_v58 = vsel %vm34_vm0, %v2020_v59, 0.0  ;;  %v2012_v60 = vadd.f32 %v2011_v23, %v2010_v15  ;;  %v2027_v8 = vsel %vm34_vm0, %v2022_v56, 0.0 }
 0x820   :  { %v2025_v4 = vsel %vm34_vm0, %v2021_v34, 0.0  ;;  %v2029_v10 = vsel %vm34_vm0, %v2023_v5, 0.0 }
 0x821   :  { %v2026_v61 = vadd.f32 %v2025_v4, %v2024_v58  ;;  %v2014_v35 = vadd.f32 %v2013_v57, %v2012_v60 }
 0x823   :  { %v2016_v63 = vadd.f32 %v2015_v62, %v2014_v35  ;;  %v2028_v13 = vadd.f32 %v2027_v8, %v2026_v61 }
 0x825   :  { %2017 = vadd.xlane.f32.xlu1 %v2016_v63  ;;  %v2030_v16 = vadd.f32 %v2029_v10, %v2028_v13 }
 0x827   :  { %2031 = vadd.xlane.f32.xlu0 %v2030_v16 }
 0x8b2   :  { %v2018_v12 = vpop.xlane.xlu1 %2017 }
 0x8b3   :  { %v2019_v25 = vmul.f32 0.001953125, %v2018_v12 }
 0x8b4   :  { %v2032_v21 = vpop.xlane.xlu0 %2031 }
 0x8b5   :  { %v2034_v37 = vmul.f32 %v2019_v25, %v2019_v25  ;;  %v2033_v24 = vmul.f32 0.001953125, %v2032_v21 }
 0x8b7   :  { %v2035_v0 = vsub.f32 %v2033_v24, %v2034_v37 }
 0x8b9   :  { %v2036_v2 = vadd.f32 1e-05, %v2035_v0 }
 0x8bb   :  { %2452 = vrsqrt.f32 %v2036_v2 }
 0x8c5   :  { %v2453_v46 = vpop.eup %2452 }
 0x8c6   :  { %v2038_v3 = vmul.f32 %v2453_v46, %v1934_v55  ;;  %v2039_v28 = vmul.f32 %v2453_v46, %v1936_v7  ;;  %v2040_v41 = vmul.f32 %v2453_v46, %v2005_v32  ;;  %v2041_v53 = vmul.f32 %v2453_v46, %v2007_v48 }
 0x8c7   :  { %v2042_v6 = vmul.f32 %v2453_v46, %v2019_v25 }
 0x8c9   :  { %v2043_v29 = vsub.f32 %v2038_v3, %v2042_v6  ;;  %v2044_v18 = vsub.f32 %v2039_v28, %v2042_v6  ;;  %v2045_v31 = vsub.f32 %v2040_v41, %v2042_v6  ;;  %v2046_v44 = vsub.f32 %v2041_v53, %v2042_v6 }
 0x8cb   :  { %v2206_v36 = vmul.f32 -1.442695, %v2043_v29  ;;  %v2207_v38 = vmul.f32 -1.442695, %v2044_v18  ;;  %v2208_v42 = vmul.f32 -1.442695, %v2045_v31 }
 0x8cc   :  { %v2209_v39 = vmul.f32 -1.442695, %v2046_v44 }
 0x8cd   :  { %2454 = vpow2.f32 %v2206_v36 }
 0x8ce   :  { %2456 = vpow2.f32 %v2207_v38 }
 0x8cf   :  { %2458 = vpow2.f32 %v2208_v42 }
 0x8d0   :  { %2460 = vpow2.f32 %v2209_v39 }
 0x8d7   :  { %v2455_v43 = vpop.eup %2454 }
 0x8d8   :  { %v2457_v45 = vpop.eup %2456  ;;  %v2059_v20 = vadd.f32 1.0, %v2455_v43  ;;  %v2109_v43 = vld [vmem:[%s3324_s3 + $0x18] sm:$0xf] }
 0x8d9   :  { %v2459_v40 = vpop.eup %2458  ;;  %v2060_v11 = vadd.f32 1.0, %v2457_v45 }
 0x8da   :  { %v2461_v52 = vpop.eup %2460  ;;  %v2061_v47 = vadd.f32 1.0, %v2459_v40  ;;  %2462 = vrcp.f32 %v2059_v20  ;;  %v2110_v40 = vld [vmem:[%s3324_s3 + $0x1c] sm:$0xf]  ;;  %s2488_s3 = scalar_lea.vmem %s2189_s26, 256 }
 0x8db   :  { %v2062_v22 = vadd.f32 1.0, %v2461_v52  ;;  %2464 = vrcp.f32 %v2060_v11  ;;  %p2489_p0 = scmp.ne.s32.totalorder %s2189_s26, %s2488_s3  ;;  %p2494_p2 = scmp.lt.s32.totalorder %s2488_s3, %s2488_s3 }
 0x8dc   :  { %2466 = vrcp.f32 %v2061_v47 }
 0x8dd   :  { %2468 = vrcp.f32 %v2062_v22  ;;  %p2495_p3 = por %p2494_p2, %p2493_p1 }
 0x8df   :  { %p2496_p4 = pnand %p2495_p3, %p2489_p0 }
 0x8e4   :  { %v2463_v49 = vpop.eup %2462 }
 0x8e5   :  { %v2465_v26 = vpop.eup %2464  ;;  %v2071_v50 = vmul.f32 %v2463_v49, %v2043_v29 }
 0x8e6   :  { %v2467_v51 = vpop.eup %2466  ;;  %v2072_v54 = vmul.f32 %v2465_v26, %v2044_v18 }
 0x8e7   :  { %v2469_v17 = vpop.eup %2468  ;;  %v2073_v27 = vmul.f32 %v2467_v51, %v2045_v31  ;;  %v2210_v30 = vmul.f32 -1.442695, %v2071_v50 }
 0x8e8   :  { %v2074_v9 = vmul.f32 %v2469_v17, %v2046_v44  ;;  %v2211_v14 = vmul.f32 -1.442695, %v2072_v54 }
 0x8e9   :  { %2470 = vpow2.f32 %v2210_v30  ;;  %v2212_v55 = vmul.f32 -1.442695, %v2073_v27 }
 0x8ea   :  { %2472 = vpow2.f32 %v2211_v14  ;;  %v2213_v32 = vmul.f32 -1.442695, %v2074_v9 }
 0x8eb   :  { %2474 = vpow2.f32 %v2212_v55 }
 0x8ec   :  { %2476 = vpow2.f32 %v2213_v32 }
 0x8f3   :  { %v2471_v15 = vpop.eup %2470 }
 0x8f4   :  { %v2473_v59 = vpop.eup %2472  ;;  %v2087_v7 = vadd.f32 1.0, %v2471_v15 }
 0x8f5   :  { %v2475_v56 = vpop.eup %2474  ;;  %v2088_v48 = vadd.f32 1.0, %v2473_v59 }
 0x8f6   :  { %v2477_v23 = vpop.eup %2476  ;;  %v2089_v34 = vadd.f32 1.0, %v2475_v56  ;;  %2478 = vrcp.f32 %v2087_v7 }
 0x8f7   :  { %v2090_v57 = vadd.f32 1.0, %v2477_v23  ;;  %2480 = vrcp.f32 %v2088_v48 }
 0x8f8   :  { %2482 = vrcp.f32 %v2089_v34 }
 0x8f9   :  { %2484 = vrcp.f32 %v2090_v57 }
 0x900   :  { %v2479_v58 = vpop.eup %2478 }
 0x901   :  { %v2481_v60 = vpop.eup %2480 }
 0x902   :  { %v2483_v4 = vpop.eup %2482  ;;  %v2103_v5 = vcombine.low %v2479_v58, %v2481_v60 }
 0x903   :  { %v2485_v8 = vpop.eup %2484 }
 0x904   :  { %v2104_v61 = vcombine.low %v2483_v4, %v2485_v8  ;;  %v2107_v35 = vmul.f32 %v2103_v5, %v2816_v33 }
 0x906   :  { %v2108_v62 = vmul.f32 %v2104_v61, %v2818_v1  ;;  %v2113_v63 = vcombine.high %v2107_v35, %v2107_v35  ;;  %v2127_v13 = vmul.f32 %v2107_v35, %v2107_v35  ;;  %v2117_v16 = vsel %vm34_vm0, %v2107_v35, 0.0 }
 0x908   :  { %v2114_v10 = vcombine.high %v2108_v62, %v2108_v62  ;;  %v2118_v12 = vsel %vm34_vm0, %v2113_v63, 0.0  ;;  %v2128_v25 = vmul.f32 %v2108_v62, %v2108_v62  ;;  %v2131_v37 = vcombine.high %v2127_v13, %v2127_v13 }
 0x909   :  { %v2119_v21 = vadd.f32 %v2118_v12, %v2117_v16  ;;  %v2120_v24 = vsel %vm34_vm0, %v2108_v62, 0.0  ;;  %v2135_v2 = vsel %vm34_vm0, %v2127_v13, 0.0 }
 0x90a   :  { %v2136_v46 = vsel %vm34_vm0, %v2131_v37, 0.0  ;;  %v2122_v33 = vsel %vm34_vm0, %v2114_v10, 0.0  ;;  %v2132_v1 = vcombine.high %v2128_v25, %v2128_v25  ;;  %v2138_v41 = vsel %vm34_vm0, %v2128_v25, 0.0 }
 0x90b   :  { %v2121_v0 = vadd.f32 %v2120_v24, %v2119_v21  ;;  %v2137_v3 = vadd.f32 %v2136_v46, %v2135_v2 }
 0x90c   :  { %v2140_v6 = vsel %vm34_vm0, %v2132_v1, 0.0 }
 0x90d   :  { %v2123_v28 = vadd.f32 %v2122_v33, %v2121_v0  ;;  %v2139_v53 = vadd.f32 %v2138_v41, %v2137_v3 }
 0x90f   :  { %2124 = vadd.xlane.f32.xlu1 %v2123_v28  ;;  %v2141_v29 = vadd.f32 %v2140_v6, %v2139_v53 }
 0x913   :  { %2142 = vadd.xlane.f32.xlu1 %v2141_v29 }
 0x99c   :  { %v2125_v18 = vpop.xlane.xlu1 %2124 }
 0x99d   :  { %v2126_v31 = vmul.f32 0.001953125, %v2125_v18 }
 0x99f   :  { %v2145_v36 = vmul.f32 %v2126_v31, %v2126_v31 }
 0x9a0   :  { %v2143_v44 = vpop.xlane.xlu1 %2142 }
 0x9a1   :  { %v2144_v38 = vmul.f32 0.001953125, %v2143_v44 }
 0x9a3   :  { %v2146_v42 = vsub.f32 %v2144_v38, %v2145_v36 }
 0x9a5   :  { %v2147_v39 = vadd.f32 1e-05, %v2146_v42 }
 0x9a7   :  { %2486 = vrsqrt.f32 %v2147_v39 }
 0x9b1   :  { %v2487_v45 = vpop.eup %2486 }
 0x9b2   :  { %v2149_v20 = vmul.f32 %v2487_v45, %v2109_v43 }
 0x9b4   :  { %2152 = vperm.xlu1 %2436, %v2149_v20   ;;  %v2164_v11 = vmul.f32 %v2149_v20, %v2126_v31 }
 0x9b6   :  { %v2165_v52 = vsub.f32 %v2110_v40, %v2164_v11 }
 0x9b8   :  { %2168 = vperm.xlu1 %2436, %v2165_v52  }
 0xa33   :  { %v2153_v47 = vpop.permute.xlu1 %2152 }
 0xa34   :  { %v2160_v22 = vrot.slane %v2153_v47, %v2795_v19 }
 0xa36   :  { %v2162_v26 = vmul.f32 %v2160_v22, %v2107_v35  ;;  %v2163_v50 = vmul.f32 %v2160_v22, %v2108_v62 }
 0xa37   :  { %v2169_v49 = vpop.permute.xlu1 %2168 }
 0xa38   :  { %v2176_v51 = vrot.slane %v2169_v49, %v2795_v19 }
 0xa3a   :  { %v2178_v54 = vadd.f32 %v2176_v51, %v2162_v26  ;;  %v2179_v17 = vadd.f32 %v2176_v51, %v2163_v50 }
 0xa3c   :  { %2180 = vst [vmem:[#allocation4] sm:$0xff] %v2178_v54  ;;  %2181 = vst [vmem:[#allocation4 + $0x8] sm:$0xff] %v2179_v17 }
 0xa3d   :  { %2499 = shalt.err (!%p2496_p4)
}
 0xa3e   :  { %s2500_s29 = scalar_lea.hbm %s3327_s6, 256 }
 0xa3f   :  { %p2501_p5 = scmp.ne.s32.totalorder %s3327_s6, %s2500_s29  ;;  %p2504_p6 = scmp.lt.u32.totalorder %s2500_s29, %s3327_s6 }
 0xa41   :  { %p2506_p7 = pnand %p2504_p6, %p2501_p5 }
 0xa43   :  { %2509 = shalt.err (!%p2506_p7)
}
 0xa44   :  { %2191 = dma.vmem_to_hbm [thread:$0]  %s2189_s26, 256, %s3327_s6, [#allocation5]  }
 0xa45   :  { %2510 = dma.done.wait [#allocation5], 256  }
 0xa46   :  { %2511 = vsyncadd [#allocation5], 4294967040 }
 0xa47   :  { %2195 = vsyncpa [#allocation5], 1 }

</bundles_post_ra>
